<compile_context>
chip_gen: v5e
topology: v5e:2x2
jax: 0.10.0
libtpu: 0.0.40
codegen_flags: <defaults>
</compile_context>

<pallas_src>
import numpy as np
import jax
import jax.numpy as jnp
from jax import lax
from jax.experimental import pallas as pl
from jax.experimental.pallas import tpu as pltpu


def _leaky_relu(x, slope=0.01):
    return jnp.where(x > 0, x, slope * x)


def _full_spec(shape):
    nd = len(shape)
    return pl.BlockSpec(shape, lambda i, _nd=nd: (0,) * _nd)


def actor_forward(x, params, h0=None, eps=0.0, test_mode=False):
    """x: (B, T, D) float32. Returns (action_logits (B,T,A), (h_n, c_n) each (1,B,H))."""
    B, T, D = x.shape
    H = params["w1"].shape[1]
    A = params["w2"].shape[1]

    if h0 is None:
        h_init = jnp.zeros((B, H), jnp.float32)
        c_init = jnp.zeros((B, H), jnp.float32)
    else:
        h_init = h0[0].reshape(B, H).astype(jnp.float32)
        c_init = h0[1].reshape(B, H).astype(jnp.float32)

    # eps-mixing constants (compile-time scalars, same math as the torch code)
    log1m_eps = float(np.log1p(-eps)) if eps < 1.0 else float("-inf")
    log_eps_uni = float(np.log(eps) - np.log(A)) if eps > 0.0 else float("-inf")

    # time-major layout so per-step gate reads are contiguous leading-dim slices
    x_tbd = jnp.transpose(x.astype(jnp.float32), (1, 0, 2))   # (T, B, D)

    def kernel(x_ref, w1_ref, b1_ref, wih_ref, whh_ref, bih_ref, bhh_ref,
               w2_ref, b2_ref, h0_ref, c0_ref,
               out_ref, hT_ref, cT_ref,
               gx_ref, hs_ref):
        # ---- hoisted: fc1 + leaky_relu + input-side gate matmul (whole slab) ----
        x_flat = x_ref[...].reshape(T * B, D)
        z1 = _leaky_relu(
            jnp.dot(x_flat, w1_ref[...], preferred_element_type=jnp.float32)
            + b1_ref[...])                                     # (T*B, H)
        bias = bih_ref[...] + bhh_ref[...]                     # (1, 4H)
        gx = jnp.dot(z1, wih_ref[...],
                     preferred_element_type=jnp.float32) + bias  # (T*B, 4H)
        gx_ref[...] = gx.reshape(T, B, 4 * H)

        # ---- hoisted weight load for the recurrence ----
        w_hh = whh_ref[...]                                    # (H, 4H)

        # ---- sequential LSTM recurrence (PyTorch gate order: i, f, g, o) ----
        def step(t, carry):
            h, c = carry
            gates = gx_ref[t] + jnp.dot(h, w_hh,
                                        preferred_element_type=jnp.float32)  # (B,4H)
            sig = jax.nn.sigmoid(gates)        # one whole-vreg EUP pass
            th = jnp.tanh(gates)               # one whole-vreg EUP pass
            i_g = sig[:, 0 * H:1 * H]
            f_g = sig[:, 1 * H:2 * H]
            g_g = th[:, 2 * H:3 * H]
            o_g = sig[:, 3 * H:4 * H]
            c_new = f_g * c + i_g * g_g
            h_new = o_g * jnp.tanh(c_new)
            hs_ref[t] = h_new
            return (h_new, c_new)

        h_fin, c_fin = lax.fori_loop(0, T, step, (h0_ref[...], c0_ref[...]),
                                     unroll=True)
        hT_ref[...] = h_fin
        cT_ref[...] = c_fin

        # ---- hoisted: fc2 + log_softmax + eps-mixing over the whole slab ----
        hs = hs_ref[...].reshape(T * B, H)
        y = jnp.dot(hs, w2_ref[...], preferred_element_type=jnp.float32) + b2_ref[...]
        m = jnp.max(y, axis=-1, keepdims=True)
        s = y - m
        lse = jnp.log(jnp.sum(jnp.exp(s), axis=-1, keepdims=True))
        logsm = s - lse                                        # (T*B, A) log-probs
        if not test_mode:
            # logsumexp(stack([logsm + log(1-eps), log(eps) - log(A)]), axis=0)
            logsm = jnp.logaddexp(logsm + log1m_eps,
                                  jnp.full_like(logsm, log_eps_uni))
        out_ref[...] = logsm.reshape(T, B, A)

    inputs = (
        x_tbd,
        params["w1"], params["b1"],
        params["w_ih"], params["w_hh"], params["b_ih"], params["b_hh"],
        params["w2"], params["b2"],
        h_init, c_init,
    )
    in_specs = [_full_spec(a.shape) for a in inputs]
    out_shapes = (
        jax.ShapeDtypeStruct((T, B, A), jnp.float32),
        jax.ShapeDtypeStruct((B, H), jnp.float32),
        jax.ShapeDtypeStruct((B, H), jnp.float32),
    )
    out_specs = (
        _full_spec((T, B, A)),
        _full_spec((B, H)),
        _full_spec((B, H)),
    )

    out_tba, h_n, c_n = pl.pallas_call(
        kernel,
        grid=(1,),
        in_specs=in_specs,
        out_specs=out_specs,
        out_shape=out_shapes,
        scratch_shapes=[pltpu.VMEM((T, B, 4 * H), jnp.float32),   # gates_x
                        pltpu.VMEM((T, B, H), jnp.float32)],      # hidden states
        compiler_params=pltpu.CompilerParams(
            dimension_semantics=("arbitrary",)),
    )(*inputs)

    action_logits = jnp.transpose(out_tba, (1, 0, 2))   # back to (B, T, A)
    return action_logits, (h_n[None], c_n[None])


def actor_forward_ref(x, params, h0=None, eps=0.0, test_mode=False):
    """Pure-JAX reference with identical math, for correctness checking."""
    B, T, D = x.shape
    H = params["w1"].shape[1]
    A = params["w2"].shape[1]
    h = jnp.zeros((B, H), jnp.float32) if h0 is None else h0[0].reshape(B, H)
    c = jnp.zeros((B, H), jnp.float32) if h0 is None else h0[1].reshape(B, H)

    z = x.astype(jnp.float32) @ params["w1"] + params["b1"]       # (B, T, H)
    z = jnp.where(z > 0, z, 0.01 * z)
    outs = []
    for t in range(T):
        gates = (z[:, t, :] @ params["w_ih"] + h @ params["w_hh"]
                 + params["b_ih"] + params["b_hh"])
        i_g = jax.nn.sigmoid(gates[:, :H])
        f_g = jax.nn.sigmoid(gates[:, H:2 * H])
        g_g = jnp.tanh(gates[:, 2 * H:3 * H])
        o_g = jax.nn.sigmoid(gates[:, 3 * H:])
        c = f_g * c + i_g * g_g
        h = o_g * jnp.tanh(c)
        outs.append(h)
    hs = jnp.stack(outs, axis=1)                                  # (B, T, H)
    y = hs @ params["w2"] + params["b2"]
    logsm = jax.nn.log_softmax(y, axis=-1)
    if not test_mode:
        logsm = jnp.logaddexp(logsm + np.log1p(-eps),
                              jnp.full_like(logsm, np.log(eps) - np.log(A)))
    return logsm, (h[None], c[None])


def make_actor_params(key, input_dim, output_dim, hidden=32):
    """Deterministic parameter init mirroring the torch module's shapes.
    fc weights are Xavier-uniform (leaky_relu / linear gain), biases zero;
    LSTM weights uniform(-1/sqrt(H), 1/sqrt(H)) like torch defaults."""
    H, A, D = hidden, output_dim, input_dim
    k1, k2, k3, k4, k5, k6 = jax.random.split(key, 6)

    def xavier_uniform(k, fan_in, fan_out, gain):
        bound = gain * np.sqrt(6.0 / (fan_in + fan_out))
        return jax.random.uniform(k, (fan_in, fan_out), jnp.float32, -bound, bound)

    gain_lrelu = float(np.sqrt(2.0 / (1.0 + 0.01 ** 2)))
    lstm_bound = 1.0 / np.sqrt(H)
    params = {
        "w1": xavier_uniform(k1, D, H, gain_lrelu),            # fc1.weight^T
        "b1": jnp.zeros((1, H), jnp.float32),
        "w_ih": jax.random.uniform(k2, (H, 4 * H), jnp.float32, -lstm_bound, lstm_bound),
        "w_hh": jax.random.uniform(k3, (H, 4 * H), jnp.float32, -lstm_bound, lstm_bound),
        "b_ih": jax.random.uniform(k4, (1, 4 * H), jnp.float32, -lstm_bound, lstm_bound),
        "b_hh": jax.random.uniform(k5, (1, 4 * H), jnp.float32, -lstm_bound, lstm_bound),
        "w2": xavier_uniform(k6, H, A, 1.0),                   # fc2.weight^T
        "b2": jnp.zeros((1, A), jnp.float32),
    }
    return params


if __name__ == "__main__":
    B, T, D, H, A = 2, 8, 16, 32, 5
    key = jax.random.PRNGKey(0)
    kx, kp = jax.random.split(key)

    x = jax.random.normal(kx, (B, T, D), jnp.float32)
    params = make_actor_params(kp, input_dim=D, output_dim=A, hidden=H)

    action_logits, (h_n, c_n) = actor_forward(x, params, h0=None, eps=0.1, test_mode=False)
    jax.block_until_ready((action_logits, h_n, c_n))

    assert action_logits.shape == (B, T, A)
    assert h_n.shape == (1, B, H) and c_n.shape == (1, B, H)

    # mixed logits should still (approximately) normalize: logsumexp over actions ~ 0
    lse = jax.nn.logsumexp(action_logits, axis=-1)
    assert bool(jnp.all(jnp.abs(lse) < 1e-4))

    # check against the pure-JAX reference
    ref_logits, (ref_h, ref_c) = actor_forward_ref(x, params, h0=None, eps=0.1, test_mode=False)
    assert bool(jnp.all(jnp.abs(action_logits - ref_logits) < 2e-4))
    assert bool(jnp.all(jnp.abs(h_n - ref_h) < 2e-4))
    assert bool(jnp.all(jnp.abs(c_n - ref_c) < 2e-4))

    print("KERNEL_OK")
</pallas_src>

<mosaic_0001>
module attributes {stable_mosaic.version = 11 : i64} {
  func.func @kernel(%arg0: i32, %arg1: memref<8x2x16xf32, #tpu.memory_space<vmem>>, %arg2: memref<16x32xf32, #tpu.memory_space<vmem>>, %arg3: memref<1x32xf32, #tpu.memory_space<vmem>>, %arg4: memref<32x128xf32, #tpu.memory_space<vmem>>, %arg5: memref<32x128xf32, #tpu.memory_space<vmem>>, %arg6: memref<1x128xf32, #tpu.memory_space<vmem>>, %arg7: memref<1x128xf32, #tpu.memory_space<vmem>>, %arg8: memref<32x5xf32, #tpu.memory_space<vmem>>, %arg9: memref<1x5xf32, #tpu.memory_space<vmem>>, %arg10: memref<2x32xf32, #tpu.memory_space<vmem>>, %arg11: memref<2x32xf32, #tpu.memory_space<vmem>>, %arg12: memref<8x2x5xf32, #tpu.memory_space<vmem>>, %arg13: memref<2x32xf32, #tpu.memory_space<vmem>>, %arg14: memref<2x32xf32, #tpu.memory_space<vmem>>, %arg15: memref<8x2x128xf32, #tpu.memory_space<vmem>>, %arg16: memref<8x2x32xf32, #tpu.memory_space<vmem>>) attributes {dimension_semantics = [#tpu.dimension_semantics<arbitrary>], iteration_bounds = array<i64: 1>, scalar_prefetch = 0 : i64, scratch_operands = 2 : i64, tpu.core_type = #tpu.core_type<tc>, window_params = [{pipeline_mode = #tpu.pipeline_mode<synchronous>, transform_indices = @transform_0, window_bounds = array<i64: 8, 2, 16>}, {pipeline_mode = #tpu.pipeline_mode<synchronous>, transform_indices = @transform_1, window_bounds = array<i64: 16, 32>}, {pipeline_mode = #tpu.pipeline_mode<synchronous>, transform_indices = @transform_2, window_bounds = array<i64: 1, 32>}, {pipeline_mode = #tpu.pipeline_mode<synchronous>, transform_indices = @transform_3, window_bounds = array<i64: 32, 128>}, {pipeline_mode = #tpu.pipeline_mode<synchronous>, transform_indices = @transform_4, window_bounds = array<i64: 32, 128>}, {pipeline_mode = #tpu.pipeline_mode<synchronous>, transform_indices = @transform_5, window_bounds = array<i64: 1, 128>}, {pipeline_mode = #tpu.pipeline_mode<synchronous>, transform_indices = @transform_6, window_bounds = array<i64: 1, 128>}, {pipeline_mode = #tpu.pipeline_mode<synchronous>, transform_indices = @transform_7, window_bounds = array<i64: 32, 5>}, {pipeline_mode = #tpu.pipeline_mode<synchronous>, transform_indices = @transform_8, window_bounds = array<i64: 1, 5>}, {pipeline_mode = #tpu.pipeline_mode<synchronous>, transform_indices = @transform_9, window_bounds = array<i64: 2, 32>}, {pipeline_mode = #tpu.pipeline_mode<synchronous>, transform_indices = @transform_10, window_bounds = array<i64: 2, 32>}, {pipeline_mode = #tpu.pipeline_mode<synchronous>, transform_indices = @transform_11, window_bounds = array<i64: 8, 2, 5>}, {pipeline_mode = #tpu.pipeline_mode<synchronous>, transform_indices = @transform_12, window_bounds = array<i64: 2, 32>}, {pipeline_mode = #tpu.pipeline_mode<synchronous>, transform_indices = @transform_13, window_bounds = array<i64: 2, 32>}]} {
    %c0 = arith.constant 0 : index
    %c0_0 = arith.constant 0 : index
    %c0_1 = arith.constant 0 : index
    %0 = vector.load %arg1[%c0, %c0_0, %c0_1] : memref<8x2x16xf32, #tpu.memory_space<vmem>>, vector<8x2x16xf32>
    %1 = vector.shape_cast %0 : vector<8x2x16xf32> to vector<16x16xf32>
    %c0_2 = arith.constant 0 : index
    %c0_3 = arith.constant 0 : index
    %2 = vector.load %arg2[%c0_2, %c0_3] : memref<16x32xf32, #tpu.memory_space<vmem>>, vector<16x32xf32>
    %cst = arith.constant dense<0.000000e+00> : vector<16x32xf32>
    %3 = tpu.matmul %1, %2, %cst {dimension_numbers = #tpu.dot_dimension_numbers<[1], [0], [0], [1], [0, 0, 1, 1], [], []>} : vector<16x16xf32>, vector<16x32xf32>, vector<16x32xf32> -> vector<16x32xf32>
    %c0_4 = arith.constant 0 : index
    %c0_5 = arith.constant 0 : index
    %4 = vector.load %arg3[%c0_4, %c0_5] : memref<1x32xf32, #tpu.memory_space<vmem>>, vector<1x32xf32>
    %5 = vector.broadcast %4 : vector<1x32xf32> to vector<16x32xf32>
    %6 = arith.addf %3, %5 : vector<16x32xf32>
    %cst_6 = arith.constant 0.000000e+00 : f32
    %7 = vector.broadcast %cst_6 : f32 to vector<16x32xf32>
    %8 = arith.cmpf ogt, %6, %7 : vector<16x32xf32>
    %cst_7 = arith.constant 0.00999999977 : f32
    %9 = vector.broadcast %cst_7 : f32 to vector<16x32xf32>
    %10 = arith.mulf %9, %6 : vector<16x32xf32>
    %11 = arith.select %8, %6, %10 : vector<16x32xi1>, vector<16x32xf32>
    %c0_8 = arith.constant 0 : index
    %c0_9 = arith.constant 0 : index
    %12 = vector.load %arg6[%c0_8, %c0_9] : memref<1x128xf32, #tpu.memory_space<vmem>>, vector<1x128xf32>
    %c0_10 = arith.constant 0 : index
    %c0_11 = arith.constant 0 : index
    %13 = vector.load %arg7[%c0_10, %c0_11] : memref<1x128xf32, #tpu.memory_space<vmem>>, vector<1x128xf32>
    %14 = arith.addf %12, %13 : vector<1x128xf32>
    %c0_12 = arith.constant 0 : index
    %c0_13 = arith.constant 0 : index
    %15 = vector.load %arg4[%c0_12, %c0_13] : memref<32x128xf32, #tpu.memory_space<vmem>>, vector<32x128xf32>
    %cst_14 = arith.constant dense<0.000000e+00> : vector<16x128xf32>
    %16 = tpu.matmul %11, %15, %cst_14 {dimension_numbers = #tpu.dot_dimension_numbers<[1], [0], [0], [1], [0, 0, 1, 1], [], []>} : vector<16x32xf32>, vector<32x128xf32>, vector<16x128xf32> -> vector<16x128xf32>
    %17 = vector.broadcast %14 : vector<1x128xf32> to vector<16x128xf32>
    %18 = arith.addf %16, %17 : vector<16x128xf32>
    %19 = vector.shape_cast %18 : vector<16x128xf32> to vector<8x2x128xf32>
    %c0_15 = arith.constant 0 : index
    %c0_16 = arith.constant 0 : index
    %c0_17 = arith.constant 0 : index
    %20 = vector.load %arg15[%c0_15, %c0_16, %c0_17] : memref<8x2x128xf32, #tpu.memory_space<vmem>>, vector<8x2x128xf32>
    tpu.vector_store %arg15[%c0_15, %c0_16, %c0_17], %19 {strides = array<i32>} : memref<8x2x128xf32, #tpu.memory_space<vmem>>, vector<8x2x128xf32>,
    %c0_18 = arith.constant 0 : index
    %c0_19 = arith.constant 0 : index
    %21 = vector.load %arg5[%c0_18, %c0_19] : memref<32x128xf32, #tpu.memory_space<vmem>>, vector<32x128xf32>
    %c0_20 = arith.constant 0 : index
    %c0_21 = arith.constant 0 : index
    %22 = vector.load %arg10[%c0_20, %c0_21] : memref<2x32xf32, #tpu.memory_space<vmem>>, vector<2x32xf32>
    %c0_22 = arith.constant 0 : index
    %c0_23 = arith.constant 0 : index
    %23 = vector.load %arg11[%c0_22, %c0_23] : memref<2x32xf32, #tpu.memory_space<vmem>>, vector<2x32xf32>
    %c0_i32 = arith.constant 0 : i32
    %24 = arith.index_cast %c0_i32 : i32 to index
    %c0_24 = arith.constant 0 : index
    %c0_25 = arith.constant 0 : index
    %25 = vector.load %arg15[%24, %c0_24, %c0_25] : memref<8x2x128xf32, #tpu.memory_space<vmem>>, vector<1x2x128xf32>
    %26 = vector.shape_cast %25 : vector<1x2x128xf32> to vector<2x128xf32>
    %cst_26 = arith.constant dense<0.000000e+00> : vector<2x128xf32>
    %27 = tpu.matmul %22, %21, %cst_26 {dimension_numbers = #tpu.dot_dimension_numbers<[1], [0], [0], [1], [0, 0, 1, 1], [], []>} : vector<2x32xf32>, vector<32x128xf32>, vector<2x128xf32> -> vector<2x128xf32>
    %28 = arith.addf %26, %27 : vector<2x128xf32>
    %29 = arith.negf %28 : vector<2x128xf32>
    %30 = math.exp %29 : vector<2x128xf32>
    %cst_27 = arith.constant 1.000000e+00 : f32
    %31 = vector.broadcast %cst_27 : f32 to vector<2x128xf32>
    %32 = arith.addf %31, %30 : vector<2x128xf32>
    %33 = arith.divf %31, %32 : vector<2x128xf32>
    %34 = math.tanh %28 : vector<2x128xf32>
    %35 = vector.extract_strided_slice %33 {offsets = [0, 0], sizes = [2, 32], strides = [1, 1]} : vector<2x128xf32> to vector<2x32xf32>
    %36 = vector.extract_strided_slice %33 {offsets = [0, 32], sizes = [2, 32], strides = [1, 1]} : vector<2x128xf32> to vector<2x32xf32>
    %37 = vector.extract_strided_slice %34 {offsets = [0, 64], sizes = [2, 32], strides = [1, 1]} : vector<2x128xf32> to vector<2x32xf32>
    %38 = vector.extract_strided_slice %33 {offsets = [0, 96], sizes = [2, 32], strides = [1, 1]} : vector<2x128xf32> to vector<2x32xf32>
    %39 = arith.mulf %36, %23 : vector<2x32xf32>
    %40 = arith.mulf %35, %37 : vector<2x32xf32>
    %41 = arith.addf %39, %40 : vector<2x32xf32>
    %42 = math.tanh %41 : vector<2x32xf32>
    %43 = arith.mulf %38, %42 : vector<2x32xf32>
    %44 = arith.index_cast %c0_i32 : i32 to index
    %c0_28 = arith.constant 0 : index
    %c0_29 = arith.constant 0 : index
    %45 = vector.load %arg16[%44, %c0_28, %c0_29] : memref<8x2x32xf32, #tpu.memory_space<vmem>>, vector<1x2x32xf32>
    %46 = vector.shape_cast %45 : vector<1x2x32xf32> to vector<2x32xf32>
    %47 = vector.shape_cast %43 : vector<2x32xf32> to vector<1x2x32xf32>
    tpu.vector_store %arg16[%44, %c0_28, %c0_29], %47 {strides = array<i32>} : memref<8x2x32xf32, #tpu.memory_space<vmem>>, vector<1x2x32xf32>,
    %c1_i32 = arith.constant 1 : i32
    %48 = arith.index_cast %c1_i32 : i32 to index
    %c0_30 = arith.constant 0 : index
    %c0_31 = arith.constant 0 : index
    %49 = vector.load %arg15[%48, %c0_30, %c0_31] : memref<8x2x128xf32, #tpu.memory_space<vmem>>, vector<1x2x128xf32>
    %50 = vector.shape_cast %49 : vector<1x2x128xf32> to vector<2x128xf32>
    %cst_32 = arith.constant dense<0.000000e+00> : vector<2x128xf32>
    %51 = tpu.matmul %43, %21, %cst_32 {dimension_numbers = #tpu.dot_dimension_numbers<[1], [0], [0], [1], [0, 0, 1, 1], [], []>} : vector<2x32xf32>, vector<32x128xf32>, vector<2x128xf32> -> vector<2x128xf32>
    %52 = arith.addf %50, %51 : vector<2x128xf32>
    %53 = arith.negf %52 : vector<2x128xf32>
    %54 = math.exp %53 : vector<2x128xf32>
    %cst_33 = arith.constant 1.000000e+00 : f32
    %55 = vector.broadcast %cst_33 : f32 to vector<2x128xf32>
    %56 = arith.addf %55, %54 : vector<2x128xf32>
    %57 = arith.divf %55, %56 : vector<2x128xf32>
    %58 = math.tanh %52 : vector<2x128xf32>
    %59 = vector.extract_strided_slice %57 {offsets = [0, 0], sizes = [2, 32], strides = [1, 1]} : vector<2x128xf32> to vector<2x32xf32>
    %60 = vector.extract_strided_slice %57 {offsets = [0, 32], sizes = [2, 32], strides = [1, 1]} : vector<2x128xf32> to vector<2x32xf32>
    %61 = vector.extract_strided_slice %58 {offsets = [0, 64], sizes = [2, 32], strides = [1, 1]} : vector<2x128xf32> to vector<2x32xf32>
    %62 = vector.extract_strided_slice %57 {offsets = [0, 96], sizes = [2, 32], strides = [1, 1]} : vector<2x128xf32> to vector<2x32xf32>
    %63 = arith.mulf %60, %41 : vector<2x32xf32>
    %64 = arith.mulf %59, %61 : vector<2x32xf32>
    %65 = arith.addf %63, %64 : vector<2x32xf32>
    %66 = math.tanh %65 : vector<2x32xf32>
    %67 = arith.mulf %62, %66 : vector<2x32xf32>
    %68 = arith.index_cast %c1_i32 : i32 to index
    %c0_34 = arith.constant 0 : index
    %c0_35 = arith.constant 0 : index
    %69 = vector.load %arg16[%68, %c0_34, %c0_35] : memref<8x2x32xf32, #tpu.memory_space<vmem>>, vector<1x2x32xf32>
    %70 = vector.shape_cast %69 : vector<1x2x32xf32> to vector<2x32xf32>
    %71 = vector.shape_cast %67 : vector<2x32xf32> to vector<1x2x32xf32>
    tpu.vector_store %arg16[%68, %c0_34, %c0_35], %71 {strides = array<i32>} : memref<8x2x32xf32, #tpu.memory_space<vmem>>, vector<1x2x32xf32>,
    %c2_i32 = arith.constant 2 : i32
    %72 = arith.index_cast %c2_i32 : i32 to index
    %c0_36 = arith.constant 0 : index
    %c0_37 = arith.constant 0 : index
    %73 = vector.load %arg15[%72, %c0_36, %c0_37] : memref<8x2x128xf32, #tpu.memory_space<vmem>>, vector<1x2x128xf32>
    %74 = vector.shape_cast %73 : vector<1x2x128xf32> to vector<2x128xf32>
    %cst_38 = arith.constant dense<0.000000e+00> : vector<2x128xf32>
    %75 = tpu.matmul %67, %21, %cst_38 {dimension_numbers = #tpu.dot_dimension_numbers<[1], [0], [0], [1], [0, 0, 1, 1], [], []>} : vector<2x32xf32>, vector<32x128xf32>, vector<2x128xf32> -> vector<2x128xf32>
    %76 = arith.addf %74, %75 : vector<2x128xf32>
    %77 = arith.negf %76 : vector<2x128xf32>
    %78 = math.exp %77 : vector<2x128xf32>
    %cst_39 = arith.constant 1.000000e+00 : f32
    %79 = vector.broadcast %cst_39 : f32 to vector<2x128xf32>
    %80 = arith.addf %79, %78 : vector<2x128xf32>
    %81 = arith.divf %79, %80 : vector<2x128xf32>
    %82 = math.tanh %76 : vector<2x128xf32>
    %83 = vector.extract_strided_slice %81 {offsets = [0, 0], sizes = [2, 32], strides = [1, 1]} : vector<2x128xf32> to vector<2x32xf32>
    %84 = vector.extract_strided_slice %81 {offsets = [0, 32], sizes = [2, 32], strides = [1, 1]} : vector<2x128xf32> to vector<2x32xf32>
    %85 = vector.extract_strided_slice %82 {offsets = [0, 64], sizes = [2, 32], strides = [1, 1]} : vector<2x128xf32> to vector<2x32xf32>
    %86 = vector.extract_strided_slice %81 {offsets = [0, 96], sizes = [2, 32], strides = [1, 1]} : vector<2x128xf32> to vector<2x32xf32>
    %87 = arith.mulf %84, %65 : vector<2x32xf32>
    %88 = arith.mulf %83, %85 : vector<2x32xf32>
    %89 = arith.addf %87, %88 : vector<2x32xf32>
    %90 = math.tanh %89 : vector<2x32xf32>
    %91 = arith.mulf %86, %90 : vector<2x32xf32>
    %92 = arith.index_cast %c2_i32 : i32 to index
    %c0_40 = arith.constant 0 : index
    %c0_41 = arith.constant 0 : index
    %93 = vector.load %arg16[%92, %c0_40, %c0_41] : memref<8x2x32xf32, #tpu.memory_space<vmem>>, vector<1x2x32xf32>
    %94 = vector.shape_cast %93 : vector<1x2x32xf32> to vector<2x32xf32>
    %95 = vector.shape_cast %91 : vector<2x32xf32> to vector<1x2x32xf32>
    tpu.vector_store %arg16[%92, %c0_40, %c0_41], %95 {strides = array<i32>} : memref<8x2x32xf32, #tpu.memory_space<vmem>>, vector<1x2x32xf32>,
    %c3_i32 = arith.constant 3 : i32
    %96 = arith.index_cast %c3_i32 : i32 to index
    %c0_42 = arith.constant 0 : index
    %c0_43 = arith.constant 0 : index
    %97 = vector.load %arg15[%96, %c0_42, %c0_43] : memref<8x2x128xf32, #tpu.memory_space<vmem>>, vector<1x2x128xf32>
    %98 = vector.shape_cast %97 : vector<1x2x128xf32> to vector<2x128xf32>
    %cst_44 = arith.constant dense<0.000000e+00> : vector<2x128xf32>
    %99 = tpu.matmul %91, %21, %cst_44 {dimension_numbers = #tpu.dot_dimension_numbers<[1], [0], [0], [1], [0, 0, 1, 1], [], []>} : vector<2x32xf32>, vector<32x128xf32>, vector<2x128xf32> -> vector<2x128xf32>
    %100 = arith.addf %98, %99 : vector<2x128xf32>
    %101 = arith.negf %100 : vector<2x128xf32>
    %102 = math.exp %101 : vector<2x128xf32>
    %cst_45 = arith.constant 1.000000e+00 : f32
    %103 = vector.broadcast %cst_45 : f32 to vector<2x128xf32>
    %104 = arith.addf %103, %102 : vector<2x128xf32>
    %105 = arith.divf %103, %104 : vector<2x128xf32>
    %106 = math.tanh %100 : vector<2x128xf32>
    %107 = vector.extract_strided_slice %105 {offsets = [0, 0], sizes = [2, 32], strides = [1, 1]} : vector<2x128xf32> to vector<2x32xf32>
    %108 = vector.extract_strided_slice %105 {offsets = [0, 32], sizes = [2, 32], strides = [1, 1]} : vector<2x128xf32> to vector<2x32xf32>
    %109 = vector.extract_strided_slice %106 {offsets = [0, 64], sizes = [2, 32], strides = [1, 1]} : vector<2x128xf32> to vector<2x32xf32>
    %110 = vector.extract_strided_slice %105 {offsets = [0, 96], sizes = [2, 32], strides = [1, 1]} : vector<2x128xf32> to vector<2x32xf32>
    %111 = arith.mulf %108, %89 : vector<2x32xf32>
    %112 = arith.mulf %107, %109 : vector<2x32xf32>
    %113 = arith.addf %111, %112 : vector<2x32xf32>
    %114 = math.tanh %113 : vector<2x32xf32>
    %115 = arith.mulf %110, %114 : vector<2x32xf32>
    %116 = arith.index_cast %c3_i32 : i32 to index
    %c0_46 = arith.constant 0 : index
    %c0_47 = arith.constant 0 : index
    %117 = vector.load %arg16[%116, %c0_46, %c0_47] : memref<8x2x32xf32, #tpu.memory_space<vmem>>, vector<1x2x32xf32>
    %118 = vector.shape_cast %117 : vector<1x2x32xf32> to vector<2x32xf32>
    %119 = vector.shape_cast %115 : vector<2x32xf32> to vector<1x2x32xf32>
    tpu.vector_store %arg16[%116, %c0_46, %c0_47], %119 {strides = array<i32>} : memref<8x2x32xf32, #tpu.memory_space<vmem>>, vector<1x2x32xf32>,
    %c4_i32 = arith.constant 4 : i32
    %120 = arith.index_cast %c4_i32 : i32 to index
    %c0_48 = arith.constant 0 : index
    %c0_49 = arith.constant 0 : index
    %121 = vector.load %arg15[%120, %c0_48, %c0_49] : memref<8x2x128xf32, #tpu.memory_space<vmem>>, vector<1x2x128xf32>
    %122 = vector.shape_cast %121 : vector<1x2x128xf32> to vector<2x128xf32>
    %cst_50 = arith.constant dense<0.000000e+00> : vector<2x128xf32>
    %123 = tpu.matmul %115, %21, %cst_50 {dimension_numbers = #tpu.dot_dimension_numbers<[1], [0], [0], [1], [0, 0, 1, 1], [], []>} : vector<2x32xf32>, vector<32x128xf32>, vector<2x128xf32> -> vector<2x128xf32>
    %124 = arith.addf %122, %123 : vector<2x128xf32>
    %125 = arith.negf %124 : vector<2x128xf32>
    %126 = math.exp %125 : vector<2x128xf32>
    %cst_51 = arith.constant 1.000000e+00 : f32
    %127 = vector.broadcast %cst_51 : f32 to vector<2x128xf32>
    %128 = arith.addf %127, %126 : vector<2x128xf32>
    %129 = arith.divf %127, %128 : vector<2x128xf32>
    %130 = math.tanh %124 : vector<2x128xf32>
    %131 = vector.extract_strided_slice %129 {offsets = [0, 0], sizes = [2, 32], strides = [1, 1]} : vector<2x128xf32> to vector<2x32xf32>
    %132 = vector.extract_strided_slice %129 {offsets = [0, 32], sizes = [2, 32], strides = [1, 1]} : vector<2x128xf32> to vector<2x32xf32>
    %133 = vector.extract_strided_slice %130 {offsets = [0, 64], sizes = [2, 32], strides = [1, 1]} : vector<2x128xf32> to vector<2x32xf32>
    %134 = vector.extract_strided_slice %129 {offsets = [0, 96], sizes = [2, 32], strides = [1, 1]} : vector<2x128xf32> to vector<2x32xf32>
    %135 = arith.mulf %132, %113 : vector<2x32xf32>
    %136 = arith.mulf %131, %133 : vector<2x32xf32>
    %137 = arith.addf %135, %136 : vector<2x32xf32>
    %138 = math.tanh %137 : vector<2x32xf32>
    %139 = arith.mulf %134, %138 : vector<2x32xf32>
    %140 = arith.index_cast %c4_i32 : i32 to index
    %c0_52 = arith.constant 0 : index
    %c0_53 = arith.constant 0 : index
    %141 = vector.load %arg16[%140, %c0_52, %c0_53] : memref<8x2x32xf32, #tpu.memory_space<vmem>>, vector<1x2x32xf32>
    %142 = vector.shape_cast %141 : vector<1x2x32xf32> to vector<2x32xf32>
    %143 = vector.shape_cast %139 : vector<2x32xf32> to vector<1x2x32xf32>
    tpu.vector_store %arg16[%140, %c0_52, %c0_53], %143 {strides = array<i32>} : memref<8x2x32xf32, #tpu.memory_space<vmem>>, vector<1x2x32xf32>,
    %c5_i32 = arith.constant 5 : i32
    %144 = arith.index_cast %c5_i32 : i32 to index
    %c0_54 = arith.constant 0 : index
    %c0_55 = arith.constant 0 : index
    %145 = vector.load %arg15[%144, %c0_54, %c0_55] : memref<8x2x128xf32, #tpu.memory_space<vmem>>, vector<1x2x128xf32>
    %146 = vector.shape_cast %145 : vector<1x2x128xf32> to vector<2x128xf32>
    %cst_56 = arith.constant dense<0.000000e+00> : vector<2x128xf32>
    %147 = tpu.matmul %139, %21, %cst_56 {dimension_numbers = #tpu.dot_dimension_numbers<[1], [0], [0], [1], [0, 0, 1, 1], [], []>} : vector<2x32xf32>, vector<32x128xf32>, vector<2x128xf32> -> vector<2x128xf32>
    %148 = arith.addf %146, %147 : vector<2x128xf32>
    %149 = arith.negf %148 : vector<2x128xf32>
    %150 = math.exp %149 : vector<2x128xf32>
    %cst_57 = arith.constant 1.000000e+00 : f32
    %151 = vector.broadcast %cst_57 : f32 to vector<2x128xf32>
    %152 = arith.addf %151, %150 : vector<2x128xf32>
    %153 = arith.divf %151, %152 : vector<2x128xf32>
    %154 = math.tanh %148 : vector<2x128xf32>
    %155 = vector.extract_strided_slice %153 {offsets = [0, 0], sizes = [2, 32], strides = [1, 1]} : vector<2x128xf32> to vector<2x32xf32>
    %156 = vector.extract_strided_slice %153 {offsets = [0, 32], sizes = [2, 32], strides = [1, 1]} : vector<2x128xf32> to vector<2x32xf32>
    %157 = vector.extract_strided_slice %154 {offsets = [0, 64], sizes = [2, 32], strides = [1, 1]} : vector<2x128xf32> to vector<2x32xf32>
    %158 = vector.extract_strided_slice %153 {offsets = [0, 96], sizes = [2, 32], strides = [1, 1]} : vector<2x128xf32> to vector<2x32xf32>
    %159 = arith.mulf %156, %137 : vector<2x32xf32>
    %160 = arith.mulf %155, %157 : vector<2x32xf32>
    %161 = arith.addf %159, %160 : vector<2x32xf32>
    %162 = math.tanh %161 : vector<2x32xf32>
    %163 = arith.mulf %158, %162 : vector<2x32xf32>
    %164 = arith.index_cast %c5_i32 : i32 to index
    %c0_58 = arith.constant 0 : index
    %c0_59 = arith.constant 0 : index
    %165 = vector.load %arg16[%164, %c0_58, %c0_59] : memref<8x2x32xf32, #tpu.memory_space<vmem>>, vector<1x2x32xf32>
    %166 = vector.shape_cast %165 : vector<1x2x32xf32> to vector<2x32xf32>
    %167 = vector.shape_cast %163 : vector<2x32xf32> to vector<1x2x32xf32>
    tpu.vector_store %arg16[%164, %c0_58, %c0_59], %167 {strides = array<i32>} : memref<8x2x32xf32, #tpu.memory_space<vmem>>, vector<1x2x32xf32>,
    %c6_i32 = arith.constant 6 : i32
    %168 = arith.index_cast %c6_i32 : i32 to index
    %c0_60 = arith.constant 0 : index
    %c0_61 = arith.constant 0 : index
    %169 = vector.load %arg15[%168, %c0_60, %c0_61] : memref<8x2x128xf32, #tpu.memory_space<vmem>>, vector<1x2x128xf32>
    %170 = vector.shape_cast %169 : vector<1x2x128xf32> to vector<2x128xf32>
    %cst_62 = arith.constant dense<0.000000e+00> : vector<2x128xf32>
    %171 = tpu.matmul %163, %21, %cst_62 {dimension_numbers = #tpu.dot_dimension_numbers<[1], [0], [0], [1], [0, 0, 1, 1], [], []>} : vector<2x32xf32>, vector<32x128xf32>, vector<2x128xf32> -> vector<2x128xf32>
    %172 = arith.addf %170, %171 : vector<2x128xf32>
    %173 = arith.negf %172 : vector<2x128xf32>
    %174 = math.exp %173 : vector<2x128xf32>
    %cst_63 = arith.constant 1.000000e+00 : f32
    %175 = vector.broadcast %cst_63 : f32 to vector<2x128xf32>
    %176 = arith.addf %175, %174 : vector<2x128xf32>
    %177 = arith.divf %175, %176 : vector<2x128xf32>
    %178 = math.tanh %172 : vector<2x128xf32>
    %179 = vector.extract_strided_slice %177 {offsets = [0, 0], sizes = [2, 32], strides = [1, 1]} : vector<2x128xf32> to vector<2x32xf32>
    %180 = vector.extract_strided_slice %177 {offsets = [0, 32], sizes = [2, 32], strides = [1, 1]} : vector<2x128xf32> to vector<2x32xf32>
    %181 = vector.extract_strided_slice %178 {offsets = [0, 64], sizes = [2, 32], strides = [1, 1]} : vector<2x128xf32> to vector<2x32xf32>
    %182 = vector.extract_strided_slice %177 {offsets = [0, 96], sizes = [2, 32], strides = [1, 1]} : vector<2x128xf32> to vector<2x32xf32>
    %183 = arith.mulf %180, %161 : vector<2x32xf32>
    %184 = arith.mulf %179, %181 : vector<2x32xf32>
    %185 = arith.addf %183, %184 : vector<2x32xf32>
    %186 = math.tanh %185 : vector<2x32xf32>
    %187 = arith.mulf %182, %186 : vector<2x32xf32>
    %188 = arith.index_cast %c6_i32 : i32 to index
    %c0_64 = arith.constant 0 : index
    %c0_65 = arith.constant 0 : index
    %189 = vector.load %arg16[%188, %c0_64, %c0_65] : memref<8x2x32xf32, #tpu.memory_space<vmem>>, vector<1x2x32xf32>
    %190 = vector.shape_cast %189 : vector<1x2x32xf32> to vector<2x32xf32>
    %191 = vector.shape_cast %187 : vector<2x32xf32> to vector<1x2x32xf32>
    tpu.vector_store %arg16[%188, %c0_64, %c0_65], %191 {strides = array<i32>} : memref<8x2x32xf32, #tpu.memory_space<vmem>>, vector<1x2x32xf32>,
    %c7_i32 = arith.constant 7 : i32
    %192 = arith.index_cast %c7_i32 : i32 to index
    %c0_66 = arith.constant 0 : index
    %c0_67 = arith.constant 0 : index
    %193 = vector.load %arg15[%192, %c0_66, %c0_67] : memref<8x2x128xf32, #tpu.memory_space<vmem>>, vector<1x2x128xf32>
    %194 = vector.shape_cast %193 : vector<1x2x128xf32> to vector<2x128xf32>
    %cst_68 = arith.constant dense<0.000000e+00> : vector<2x128xf32>
    %195 = tpu.matmul %187, %21, %cst_68 {dimension_numbers = #tpu.dot_dimension_numbers<[1], [0], [0], [1], [0, 0, 1, 1], [], []>} : vector<2x32xf32>, vector<32x128xf32>, vector<2x128xf32> -> vector<2x128xf32>
    %196 = arith.addf %194, %195 : vector<2x128xf32>
    %197 = arith.negf %196 : vector<2x128xf32>
    %198 = math.exp %197 : vector<2x128xf32>
    %cst_69 = arith.constant 1.000000e+00 : f32
    %199 = vector.broadcast %cst_69 : f32 to vector<2x128xf32>
    %200 = arith.addf %199, %198 : vector<2x128xf32>
    %201 = arith.divf %199, %200 : vector<2x128xf32>
    %202 = math.tanh %196 : vector<2x128xf32>
    %203 = vector.extract_strided_slice %201 {offsets = [0, 0], sizes = [2, 32], strides = [1, 1]} : vector<2x128xf32> to vector<2x32xf32>
    %204 = vector.extract_strided_slice %201 {offsets = [0, 32], sizes = [2, 32], strides = [1, 1]} : vector<2x128xf32> to vector<2x32xf32>
    %205 = vector.extract_strided_slice %202 {offsets = [0, 64], sizes = [2, 32], strides = [1, 1]} : vector<2x128xf32> to vector<2x32xf32>
    %206 = vector.extract_strided_slice %201 {offsets = [0, 96], sizes = [2, 32], strides = [1, 1]} : vector<2x128xf32> to vector<2x32xf32>
    %207 = arith.mulf %204, %185 : vector<2x32xf32>
    %208 = arith.mulf %203, %205 : vector<2x32xf32>
    %209 = arith.addf %207, %208 : vector<2x32xf32>
    %210 = math.tanh %209 : vector<2x32xf32>
    %211 = arith.mulf %206, %210 : vector<2x32xf32>
    %212 = arith.index_cast %c7_i32 : i32 to index
    %c0_70 = arith.constant 0 : index
    %c0_71 = arith.constant 0 : index
    %213 = vector.load %arg16[%212, %c0_70, %c0_71] : memref<8x2x32xf32, #tpu.memory_space<vmem>>, vector<1x2x32xf32>
    %214 = vector.shape_cast %213 : vector<1x2x32xf32> to vector<2x32xf32>
    %215 = vector.shape_cast %211 : vector<2x32xf32> to vector<1x2x32xf32>
    tpu.vector_store %arg16[%212, %c0_70, %c0_71], %215 {strides = array<i32>} : memref<8x2x32xf32, #tpu.memory_space<vmem>>, vector<1x2x32xf32>,
    %c8_i32 = arith.constant 8 : i32
    %c0_72 = arith.constant 0 : index
    %c0_73 = arith.constant 0 : index
    %216 = vector.load %arg13[%c0_72, %c0_73] : memref<2x32xf32, #tpu.memory_space<vmem>>, vector<2x32xf32>
    tpu.vector_store %arg13[%c0_72, %c0_73], %211 {strides = array<i32>} : memref<2x32xf32, #tpu.memory_space<vmem>>, vector<2x32xf32>,
    %c0_74 = arith.constant 0 : index
    %c0_75 = arith.constant 0 : index
    %217 = vector.load %arg14[%c0_74, %c0_75] : memref<2x32xf32, #tpu.memory_space<vmem>>, vector<2x32xf32>
    tpu.vector_store %arg14[%c0_74, %c0_75], %209 {strides = array<i32>} : memref<2x32xf32, #tpu.memory_space<vmem>>, vector<2x32xf32>,
    %c0_76 = arith.constant 0 : index
    %c0_77 = arith.constant 0 : index
    %c0_78 = arith.constant 0 : index
    %218 = vector.load %arg16[%c0_76, %c0_77, %c0_78] : memref<8x2x32xf32, #tpu.memory_space<vmem>>, vector<8x2x32xf32>
    %219 = vector.shape_cast %218 : vector<8x2x32xf32> to vector<16x32xf32>
    %c0_79 = arith.constant 0 : index
    %c0_80 = arith.constant 0 : index
    %220 = vector.load %arg8[%c0_79, %c0_80] : memref<32x5xf32, #tpu.memory_space<vmem>>, vector<32x5xf32>
    %cst_81 = arith.constant dense<0.000000e+00> : vector<16x5xf32>
    %221 = tpu.matmul %219, %220, %cst_81 {dimension_numbers = #tpu.dot_dimension_numbers<[1], [0], [0], [1], [0, 0, 1, 1], [], []>} : vector<16x32xf32>, vector<32x5xf32>, vector<16x5xf32> -> vector<16x5xf32>
    %c0_82 = arith.constant 0 : index
    %c0_83 = arith.constant 0 : index
    %222 = vector.load %arg9[%c0_82, %c0_83] : memref<1x5xf32, #tpu.memory_space<vmem>>, vector<1x5xf32>
    %223 = vector.broadcast %222 : vector<1x5xf32> to vector<16x5xf32>
    %224 = arith.addf %221, %223 : vector<16x5xf32>
    %cst_84 = arith.constant dense<0xFF800000> : vector<16xf32>
    %225 = vector.multi_reduction <maximumf>, %224, %cst_84 [1] : vector<16x5xf32> to vector<16xf32>
    %226 = vector.shape_cast %225 : vector<16xf32> to vector<16x1xf32>
    %227 = vector.broadcast %226 : vector<16x1xf32> to vector<16x5xf32>
    %228 = arith.subf %224, %227 : vector<16x5xf32>
    %229 = math.exp %228 : vector<16x5xf32>
    %cst_85 = arith.constant dense<0.000000e+00> : vector<16xf32>
    %230 = vector.multi_reduction <add>, %229, %cst_85 [1] : vector<16x5xf32> to vector<16xf32>
    %231 = vector.shape_cast %230 : vector<16xf32> to vector<16x1xf32>
    %232 = math.log %231 : vector<16x1xf32>
    %233 = vector.broadcast %232 : vector<16x1xf32> to vector<16x5xf32>
    %234 = arith.subf %228, %233 : vector<16x5xf32>
    %cst_86 = arith.constant -0.105360515 : f32
    %235 = vector.broadcast %cst_86 : f32 to vector<16x5xf32>
    %236 = arith.addf %234, %235 : vector<16x5xf32>
    %cst_87 = arith.constant -3.91202307 : f32
    %237 = vector.broadcast %cst_87 : f32 to vector<16x5xf32>
    %238 = arith.maximumf %236, %237 : vector<16x5xf32>
    %239 = arith.subf %236, %237 : vector<16x5xf32>
    %240 = arith.cmpf one, %239, %239 : vector<16x5xf32>
    %241 = arith.addf %236, %237 : vector<16x5xf32>
    %242 = math.absf %239 : vector<16x5xf32>
    %cst_88 = arith.constant 0.000000e+00 : f32
    %243 = vector.broadcast %cst_88 : f32 to vector<16x5xf32>
    %244 = arith.subf %243, %242 : vector<16x5xf32>
    %245 = math.exp %244 : vector<16x5xf32>
    %246 = math.log1p %245 : vector<16x5xf32>
    %247 = arith.addf %238, %246 : vector<16x5xf32>
    %248 = arith.select %240, %241, %247 : vector<16x5xi1>, vector<16x5xf32>
    %249 = vector.shape_cast %248 : vector<16x5xf32> to vector<8x2x5xf32>
    %c0_89 = arith.constant 0 : index
    %c0_90 = arith.constant 0 : index
    %c0_91 = arith.constant 0 : index
    %250 = vector.load %arg12[%c0_89, %c0_90, %c0_91] : memref<8x2x5xf32, #tpu.memory_space<vmem>>, vector<8x2x5xf32>
    tpu.vector_store %arg12[%c0_89, %c0_90, %c0_91], %249 {strides = array<i32>} : memref<8x2x5xf32, #tpu.memory_space<vmem>>, vector<8x2x5xf32>,
    return
  }
  func.func @transform_0(%arg0: i32) -> (i32, i32, i32) {
    %c0_i32 = arith.constant 0 : i32
    %c0_i32_0 = arith.constant 0 : i32
    %c0_i32_1 = arith.constant 0 : i32
    %c0_i32_2 = arith.constant 0 : i32
    return %c0_i32, %c0_i32_0, %c0_i32_1 : i32, i32, i32
  }
  func.func @transform_1(%arg0: i32) -> (i32, i32) {
    %c0_i32 = arith.constant 0 : i32
    %c0_i32_0 = arith.constant 0 : i32
    %c0_i32_1 = arith.constant 0 : i32
    return %c0_i32, %c0_i32_0 : i32, i32
  }
  func.func @transform_2(%arg0: i32) -> (i32, i32) {
    %c0_i32 = arith.constant 0 : i32
    %c0_i32_0 = arith.constant 0 : i32
    %c0_i32_1 = arith.constant 0 : i32
    return %c0_i32, %c0_i32_0 : i32, i32
  }
  func.func @transform_3(%arg0: i32) -> (i32, i32) {
    %c0_i32 = arith.constant 0 : i32
    %c0_i32_0 = arith.constant 0 : i32
    %c0_i32_1 = arith.constant 0 : i32
    return %c0_i32, %c0_i32_0 : i32, i32
  }
  func.func @transform_4(%arg0: i32) -> (i32, i32) {
    %c0_i32 = arith.constant 0 : i32
    %c0_i32_0 = arith.constant 0 : i32
    %c0_i32_1 = arith.constant 0 : i32
    return %c0_i32, %c0_i32_0 : i32, i32
  }
  func.func @transform_5(%arg0: i32) -> (i32, i32) {
    %c0_i32 = arith.constant 0 : i32
    %c0_i32_0 = arith.constant 0 : i32
    %c0_i32_1 = arith.constant 0 : i32
    return %c0_i32, %c0_i32_0 : i32, i32
  }
  func.func @transform_6(%arg0: i32) -> (i32, i32) {
    %c0_i32 = arith.constant 0 : i32
    %c0_i32_0 = arith.constant 0 : i32
    %c0_i32_1 = arith.constant 0 : i32
    return %c0_i32, %c0_i32_0 : i32, i32
  }
  func.func @transform_7(%arg0: i32) -> (i32, i32) {
    %c0_i32 = arith.constant 0 : i32
    %c0_i32_0 = arith.constant 0 : i32
    %c0_i32_1 = arith.constant 0 : i32
    return %c0_i32, %c0_i32_0 : i32, i32
  }
  func.func @transform_8(%arg0: i32) -> (i32, i32) {
    %c0_i32 = arith.constant 0 : i32
    %c0_i32_0 = arith.constant 0 : i32
    %c0_i32_1 = arith.constant 0 : i32
    return %c0_i32, %c0_i32_0 : i32, i32
  }
  func.func @transform_9(%arg0: i32) -> (i32, i32) {
    %c0_i32 = arith.constant 0 : i32
    %c0_i32_0 = arith.constant 0 : i32
    %c0_i32_1 = arith.constant 0 : i32
    return %c0_i32, %c0_i32_0 : i32, i32
  }
  func.func @transform_10(%arg0: i32) -> (i32, i32) {
    %c0_i32 = arith.constant 0 : i32
    %c0_i32_0 = arith.constant 0 : i32
    %c0_i32_1 = arith.constant 0 : i32
    return %c0_i32, %c0_i32_0 : i32, i32
  }
  func.func @transform_11(%arg0: i32) -> (i32, i32, i32) {
    %c0_i32 = arith.constant 0 : i32
    %c0_i32_0 = arith.constant 0 : i32
    %c0_i32_1 = arith.constant 0 : i32
    %c0_i32_2 = arith.constant 0 : i32
    return %c0_i32, %c0_i32_0, %c0_i32_1 : i32, i32, i32
  }
  func.func @transform_12(%arg0: i32) -> (i32, i32) {
    %c0_i32 = arith.constant 0 : i32
    %c0_i32_0 = arith.constant 0 : i32
    %c0_i32_1 = arith.constant 0 : i32
    return %c0_i32, %c0_i32_0 : i32, i32
  }
  func.func @transform_13(%arg0: i32) -> (i32, i32) {
    %c0_i32 = arith.constant 0 : i32
    %c0_i32_0 = arith.constant 0 : i32
    %c0_i32_1 = arith.constant 0 : i32
    return %c0_i32, %c0_i32_0 : i32, i32
  }
}

</mosaic_0001>

<bundles_post_ra>
// kernel: tpu_custom_call.1
= control target key start
LH: loop header
LB: loop body
LE: loop exit
PB: predicated region body
PF: predicated region fallthrough
CT: control target
= control target key end

     0   :  { %19 = vsyncpa [#allocation5], 0  ;;  %s1501_s0 = inlined_call_operand.hbm [shape: f32[8,2,16], index: 0, kind: input, shape index: {}]   ;;  %s1502_s1 = inlined_call_operand.hbm [shape: f32[16,32], index: 1, kind: input, shape index: {}]   ;;  %s1503_s2 = inlined_call_operand.vmem [shape: f32[1,32], index: 2, kind: input, shape index: {}]   ;;  %s1504_s3 = inlined_call_operand.vmem [shape: f32[32,128], index: 3, kind: input, shape index: {}]   ;;  %s1505_s4 = inlined_call_operand.hbm [shape: f32[32,128], index: 4, kind: input, shape index: {}]   ;;  %s1506_s5 = inlined_call_operand.vmem [shape: f32[1,128], index: 5, kind: input, shape index: {}]   ;;  %s1507_s6 = inlined_call_operand.vmem [shape: f32[1,128], index: 6, kind: input, shape index: {}]   ;;  %s1508_s7 = inlined_call_operand.vmem [shape: f32[32,5], index: 7, kind: input, shape index: {}]   ;;  %s1509_s8 = inlined_call_operand.vmem [shape: f32[1,5], index: 8, kind: input, shape index: {}]   ;;  %s1510_s9 = inlined_call_operand.vmem [shape: f32[2,32], index: 9, kind: input, shape index: {}]   ;;  %s1511_s10 = inlined_call_operand.vmem [shape: f32[2,32], index: 10, kind: input, shape index: {}]   ;;  %s1512_s11 = inlined_call_operand.vmem [shape: f32[8,2,5], index: 11, kind: output, shape index: {0}]   ;;  %s1513_s12 = inlined_call_operand.hbm [shape: f32[2,32], index: 12, kind: output, shape index: {1}]   ;;  %s1514_s13 = inlined_call_operand.hbm [shape: f32[2,32], index: 13, kind: output, shape index: {2}]  }
   0x1   :  { %20 = vsyncpa [#allocation8], 0 }
   0x2   :  { %21 = vsyncpa [#allocation6], 0  ;;  %s40_s27 = sshll.u32 %s1502_s1, 4  ;;  %s41_s27 = int_to_ptr.hbm [resolvable:$true] %s40_s27 }
   0x3   :  { %22 = vsyncpa [#allocation12], 0  ;;  %s1226_s28 = smov [#allocation7]   ;;  %s27_s15 = sshll.u32 %s1501_s0, 4  ;;  %s28_s15 = int_to_ptr.hbm [resolvable:$true] %s27_s15 }
   0x4   :  { %s42_s29 = sshll.u32 %s1226_s28, 4  ;;  %s1227_s16 = smov 128   ;;  %s43_s29 = int_to_ptr.vmem [resolvable:$true] %s42_s29 }
   0x5   :  { %s1228_s17 = smov 8   ;;  %s1229_s18 = smov [#allocation4]  }
   0x6   :  { %48 = dma.hbm_to_vmem [thread:$0]  %s41_s27, 256, %s43_s29, [#allocation8], %s1227_s16, %s1227_s16, %s1228_s17  }
   0x7   :  { %s29_s19 = sshll.u32 %s1229_s18, 4  ;;  %s1230_s20 = smov 32   ;;  %s30_s19 = int_to_ptr.vmem [resolvable:$true] %s29_s19 }
   0x8   :  { %s1231_s21 = smov 2   ;;  %s57_s23 = sshll.u32 %s1505_s4, 4  ;;  %s58_s23 = int_to_ptr.hbm [resolvable:$true] %s57_s23 }
   0x9   :  { %35 = dma.hbm_to_vmem [thread:$0]  %s28_s15, 256, %s30_s19, [#allocation5], %s1230_s20, %s1230_s20, %s1231_s21  }
   0xa   :  { %s1232_s24 = smov [#allocation9]  }
   0xb   :  { %s59_s25 = sshll.u32 %s1232_s24, 4  ;;  %s60_s25 = int_to_ptr.vmem [resolvable:$true] %s59_s25 }
   0xc   :  { %65 = dma.hbm_to_vmem [thread:$0]  %s58_s23, 512, %s60_s25, [#allocation8], %s1227_s16, %s1227_s16, %s1228_s17  }
   0xd   :  { %1218 = dma.done.wait [#allocation5], 256  }
   0xe   :  { %1219 = vsyncadd [#allocation5], 4294967040 }
   0xf   :  { %1220 = dma.done.wait [#allocation8], 768  }
  0x10   :  { %1221 = vsyncadd [#allocation8], 4294966528  ;;  %v99_v0 = vld [vmem:[#allocation7 + $0x8] sm:$0xff]  ;;  %v98_v1 = vld [vmem:[#allocation7] sm:$0xff]  ;;  %vm129_vm0 = vcmask 130048   ;;  %vm173_vm1 = vcmask 261120  }
  0x11   :  { %v90_v2 = vld [vmem:[#allocation4] sm:$0x3]  ;;  %148 = vmatpush.msra.mxu0 %v99_v0  ;;  %v91_v3 = vld [vmem:[#allocation4 + $0x2] sm:$0x3]  ;;  %v92_v4 = vld [vmem:[#allocation4 + $0x4] sm:$0x3]  ;;  %1003 = vmatpush.msra.mxu1 %v99_v0 }
  0x12   :  { %v93_v5 = vld [vmem:[#allocation4 + $0x6] sm:$0x3]  ;;  %112 = vst [vmem:[#allocation1] ss:$4 sm:$0xff] %v90_v2  ;;  %v94_v6 = vld [vmem:[#allocation4 + $0x8] sm:$0x3] }
  0x13   :  { %149 = vmatpush.msra.mxu0 %v98_v1  ;;  %114 = vst [vmem:[#allocation1 + $0x1] ss:$4 sm:$0xff] %v91_v3  ;;  %1004 = vmatpush.msra.mxu1 %v98_v1  ;;  %v95_v7 = vld [vmem:[#allocation4 + $0xa] sm:$0x3]  ;;  %v169_v8 = vld [vmem:[%s1504_s3 + $0x18] sm:$0xff]  ;;  %v167_v14 = vld [vmem:[%s1504_s3 + $0x8] sm:$0xff] }
  0x14   :  { %116 = vst [vmem:[#allocation1 + $0x2] ss:$4 sm:$0xff] %v92_v4  ;;  %v96_v9 = vld [vmem:[#allocation4 + $0xc] sm:$0x3]  ;;  %v97_v10 = vld [vmem:[#allocation4 + $0xe] sm:$0x3] }
  0x15   :  { %118 = vst [vmem:[#allocation1 + $0x3] ss:$4 sm:$0xff] %v93_v5  ;;  %192 = vmatpush.msrb.mxu1 %v169_v8  ;;  %v168_v13 = vld [vmem:[%s1504_s3 + $0x10] sm:$0xff]  ;;  %v1327_v15 = vld [vmem:[#allocation9 + $0x18] sm:$0xff]  ;;  %v1333_v17 = vld [vmem:[#allocation9 + $0x10] sm:$0xff]  ;;  %vm301_vm8 = vcmask 254976  }
  0x16   :  { %120 = vst [vmem:[#allocation1 + $0x20] ss:$4 sm:$0xff] %v94_v6  ;;  %247 = vmatpush.msra.mxu2 %v1327_v15  ;;  %v166_v16 = vld [vmem:[%s1504_s3] sm:$0xff]  ;;  %319 = vmatpush.msra.mxu3 %v1327_v15  ;;  %v1338_v18 = vld [vmem:[#allocation9 + $0x8] sm:$0xff]  ;;  %v1340_v19 = vld [vmem:[#allocation9] sm:$0xff]  ;;  %s1234_s27 = smov 96  }
  0x17   :  { %122 = vst [vmem:[#allocation1 + $0x21] ss:$4 sm:$0xff] %v95_v7  ;;  %193 = vmatpush.msrb.mxu1 %v168_v13  ;;  %523 = vmatpush.msrb.mxu0 %v1327_v15  ;;  %v229_v20 = vld [vmem:[%s1510_s9] sm:$0x3]  ;;  %s1235_s9 = smov [#allocation10]   ;;  %s950_s19 = sshll.u32 %s1513_s12, 4  ;;  %s951_s19 = int_to_ptr.hbm [resolvable:$true] %s950_s19 }
  0x18   :  { %124 = vst [vmem:[#allocation1 + $0x22] ss:$4 sm:$0xff] %v96_v9  ;;  %248 = vmatpush.msra.mxu2 %v1333_v17  ;;  %320 = vmatpush.msra.mxu3 %v1333_v17  ;;  %v1016_v21 = vld [vmem:[%s1503_s2] ss:$0 sm:$0xff]  ;;  %s948_s16 = sshll.u32 %s1235_s9, 4  ;;  %s1236_s2 = smov [#allocation11]   ;;  %s949_s16 = int_to_ptr.vmem [resolvable:$true] %s948_s16 }
  0x19   :  { %126 = vst [vmem:[#allocation1 + $0x23] ss:$4 sm:$0xff] %v97_v10  ;;  %194 = vmatpush.msrb.mxu1 %v167_v14  ;;  %524 = vmatpush.msrb.mxu0 %v1333_v17  ;;  %v163_v30 = vld [vmem:[%s1506_s5] sm:$0x1]  ;;  %s1233_s5 = smov 64  }
  0x1a   :  { %249 = vmatpush.msra.mxu2 %v1338_v18  ;;  %321 = vmatpush.msra.mxu3 %v1338_v18  ;;  %v164_v31 = vld [vmem:[%s1507_s6] sm:$0x1] }
  0x1b   :  { %195 = vmatpush.msrb.mxu1 %v166_v16  ;;  %525 = vmatpush.msrb.mxu0 %v1338_v18  ;;  %v165_v32 = vadd.f32 %v164_v31, %v163_v30  ;;  %v230_v48 = vld [vmem:[%s1511_s10] sm:$0x3]  ;;  %s961_s10 = sshll.u32 %s1514_s13, 4  ;;  %s962_s10 = int_to_ptr.hbm [resolvable:$true] %s961_s10 }
  0x1c   :  { %v127_v11 = vld.sshfl [vmem:[#allocation1] sm:$0xff pattern:$0x73625140]  ;;  %250 = vmatpush.msra.mxu2 %v1340_v19  ;;  %322 = vmatpush.msra.mxu3 %v1340_v19 }
  0x1d   :  { %979 = vmatmul.msk.f32.vlgmr.msra.gmra.mxu0 %vm129_vm0, %v127_v11  ;;  %983 = vmatmul.msk.f32.vlgmr.msra.gmra.mxu2 %vm173_vm1, %v229_v20  ;;  %v171_v33 = vperm.slane %v165_v32, 0 }
  0x1e   :  { %387 = vmatpush.msrb.mxu2 %v1327_v15  ;;  %455 = vmatpush.msrb.mxu3 %v1327_v15 }
  0x1f   :  { %526 = vmatpush.msrb.mxu0 %v1340_v19 }
  0x20   :  { %v128_v12 = vld.sshfl [vmem:[#allocation1 + $0x20] sm:$0xff pattern:$0x73625140]  ;;  %388 = vmatpush.msrb.mxu2 %v1333_v17  ;;  %456 = vmatpush.msrb.mxu3 %v1333_v17 }
  0x21   :  { %980 = vmatmul.msk.f32.vlgmr.msra.gmra.mxu1 %vm129_vm0, %v128_v12 }
  0x22   :  { %591 = vmatpush.msra.mxu1 %v1327_v15  ;;  %389 = vmatpush.msrb.mxu2 %v1338_v18 }
  0x23   :  { %457 = vmatpush.msrb.mxu3 %v1338_v18 }
  0x24   :  { %592 = vmatpush.msra.mxu1 %v1333_v17  ;;  %390 = vmatpush.msrb.mxu2 %v1340_v19 }
  0x25   :  { %458 = vmatpush.msrb.mxu3 %v1340_v19 }
  0x26   :  { %593 = vmatpush.msra.mxu1 %v1338_v18  ;;  %659 = vmatpush.msra.mxu2 %v1327_v15 }
  0x28   :  { %594 = vmatpush.msra.mxu1 %v1340_v19  ;;  %660 = vmatpush.msra.mxu2 %v1333_v17 }
  0x2a   :  { %661 = vmatpush.msra.mxu2 %v1338_v18 }
  0x2c   :  { %662 = vmatpush.msra.mxu2 %v1340_v19 }
  0x9a   :  { %v151_v22 = vpop.f32.mrf.mxu0 }
  0x9b   :  { %v152_v23 = vadd.f32 %v1016_v21, %v151_v22 }
  0x9d   :  { %vm157_vm2 = vcmp.gt.f32.partialorder %v152_v23, 0.0  ;;  %v159_v24 = vmul.f32 0.01, %v152_v23 }
  0x9e   :  { %v154_v25 = vpop.f32.mrf.mxu1 }
  0x9f   :  { %v161_v26 = vsel %vm157_vm2, %v152_v23, %v159_v24  ;;  %v155_v27 = vadd.f32 %v1016_v21, %v154_v25 }
  0xa0   :  { %981 = vmatmul.msk.f32.vlgmr.msrb.gmra.mxu1 %vm173_vm1, %v161_v26  ;;  %v252_v39 = vpop.f32.mrf.mxu2 }
  0xa1   :  { %v160_v28 = vmul.f32 0.01, %v155_v27  ;;  %vm158_vm3 = vcmp.gt.f32.partialorder %v155_v27, 0.0 }
  0xa3   :  { %v162_v29 = vsel %vm158_vm3, %v155_v27, %v160_v28 }
  0xa8   :  { %982 = vmatmul.msk.f32.gmra.mxu1 %vm173_vm1, %v162_v29 }
 0x11d   :  { %v197_v34 = vpop.f32.mrf.mxu1 }
 0x11e   :  { %v198_v35 = vadd.f32 %v197_v34, %v171_v33 }
 0x120   :  { %v205_v36 = vrot.slane %v198_v35, 2  ;;  %v206_v37 = vrot.slane %v198_v35, 4  ;;  %v207_v38 = vrot.slane %v198_v35, 6  ;;  %217 = vst [vmem:[#allocation2] sm:$0x3] %v198_v35 }
 0x122   :  { %218 = vst [vmem:[#allocation2 + $0x2] sm:$0x3] %v205_v36 }
 0x123   :  { %219 = vst [vmem:[#allocation2 + $0x4] sm:$0x3] %v206_v37 }
 0x124   :  { %220 = vst [vmem:[#allocation2 + $0x6] sm:$0x3] %v207_v38 }
 0x125   :  { %v200_v40 = vpop.f32.mrf.mxu1 }
 0x126   :  { %v201_v41 = vadd.f32 %v200_v40, %v171_v33 }
 0x127   :  { %v231_v42 = vld [vmem:[#allocation2] sm:$0x3] }
 0x128   :  { %v255_v43 = vadd.f32 %v252_v39, %v231_v42  ;;  %v208_v44 = vrot.slane %v201_v41, 2  ;;  %v209_v45 = vrot.slane %v201_v41, 4  ;;  %v210_v46 = vrot.slane %v201_v41, 6  ;;  %221 = vst [vmem:[#allocation2 + $0x8] sm:$0x3] %v201_v41 }
 0x129   :  { %v304_v9 = vld [vmem:[#allocation2 + $0x2] sm:$0x3] }
 0x12a   :  { %1018 = vtanh.f32 %v255_v43  ;;  %222 = vst [vmem:[#allocation2 + $0xa] sm:$0x3] %v208_v44  ;;  %v984_v49 = vmul.f32 -1.442695, %v255_v43  ;;  %v372_v36 = vld [vmem:[#allocation2 + $0x4] sm:$0x3] }
 0x12b   :  { %223 = vst [vmem:[#allocation2 + $0xc] sm:$0x3] %v209_v45 }
 0x12c   :  { %224 = vst [vmem:[#allocation2 + $0xe] sm:$0x3] %v210_v46  ;;  %1020 = vpow2.f32 %v984_v49 }
 0x130   :  { %v1019_v47 = vpop.eup %1018 }
 0x131   :  { %282 = vrot.lane.b32.xlu0 %v1019_v47, %s1233_s5 }
 0x132   :  { %v1021_v50 = vpop.eup %1020 }
 0x133   :  { %v259_v51 = vadd.f32 1.0, %v1021_v50 }
 0x135   :  { %1022 = vrcp.f32 %v259_v51  ;;  %v271_v57 = vand.u32 2147483648, %v259_v51  ;;  %vm265_vm5 = vweird.f32 %v259_v51  ;;  %v269_v58 = vand.u32 2147483647, %v259_v51 }
 0x137   :  { %v272_v60 = vor.u32 1.1754944e-38, %v271_v57  ;;  %vm270_vm7 = vcmp.eq.f32.partialorder %v269_v58, 8.507059e+37 }
 0x139   :  { %277 = vrot.lane.b32.xlu0 %v230_v48, %s1230_s20 }
 0x13b   :  { %v1023_v52 = vpop.eup %1022 }
 0x13c   :  { %v261_v53 = vmul.f32 %v1023_v52, %v259_v51  ;;  %vm266_vm4 = vweird.f32 %v1023_v52 }
 0x13d   :  { %vm267_vm6 = vmor %vm265_vm5, %vm266_vm4 }
 0x13e   :  { %v262_v54 = vsub.f32 1.0, %v261_v53 }
 0x140   :  { %v263_v55 = vmul.f32 %v1023_v52, %v262_v54 }
 0x142   :  { %v264_v56 = vadd.f32 %v1023_v52, %v263_v55 }
 0x144   :  { %v268_v59 = vsel %vm267_vm6, %v1023_v52, %v264_v56 }
 0x145   :  { %v273_v62 = vsel %vm270_vm7, %v272_v60, %v268_v59 }
 0x1a3   :  { %v283_v61 = vpop.permute.xlu0 %282 }
 0x1a4   :  { %v285_v63 = vmul.f32 %v283_v61, %v273_v62 }
 0x1a6   :  { %287 = vrot.lane.b32.xlu1 %v285_v63, %s1230_s20  ;;  %v440_v63 = vld [vmem:[#allocation2 + $0x6] sm:$0x3] }
 0x1ab   :  { %v278_v0 = vpop.permute.xlu0 %277 }
 0x1ac   :  { %v280_v1 = vmul.f32 %v278_v0, %v273_v62 }
 0x218   :  { %v288_v2 = vpop.permute.xlu1 %287 }
 0x219   :  { %v290_v3 = vadd.f32 %v288_v2, %v280_v1 }
 0x21b   :  { %1024 = vtanh.f32 %v290_v3 }
 0x221   :  { %v1025_v4 = vpop.eup %1024 }
 0x222   :  { %293 = vrot.lane.b32.xlu1 %v1025_v4, %s1233_s5 }
 0x294   :  { %v294_v5 = vpop.permute.xlu1 %293 }
 0x295   :  { %v296_v6 = vmul.f32 %v294_v5, %v273_v62 }
 0x297   :  { %298 = vrot.lane.b32.xlu2 %v296_v6, %s1230_s20 }
 0x2f1   :  { %v299_v7 = vpop.permute.xlu2 %298 }
 0x2f2   :  { %302 = vst.msk [vmem:[#allocation3] sm:$0x3] %vm301_vm8, %v299_v7  ;;  %985 = vmatmul.msk.f32.vlgmr.msra.gmra.mxu3 %vm173_vm1, %v299_v7 }
 0x2f3   :  { %727 = vmatpush.msra.mxu3 %v1327_v15 }
 0x2f5   :  { %728 = vmatpush.msra.mxu3 %v1333_v17 }
 0x2f7   :  { %729 = vmatpush.msra.mxu3 %v1338_v18 }
 0x2f9   :  { %v785_v8 = vld [vmem:[#allocation3] sm:$0x3]  ;;  %730 = vmatpush.msra.mxu3 %v1340_v19 }
 0x2fa   :  { %809 = vst [vmem:[#allocation1] ss:$4 sm:$0xff] %v785_v8 }
 0x375   :  { %v324_v10 = vpop.f32.mrf.mxu3 }
 0x376   :  { %v327_v11 = vadd.f32 %v324_v10, %v304_v9 }
 0x378   :  { %1026 = vtanh.f32 %v327_v11  ;;  %v986_v13 = vmul.f32 -1.442695, %v327_v11 }
 0x37a   :  { %1028 = vpow2.f32 %v986_v13 }
 0x37e   :  { %v1027_v12 = vpop.eup %1026 }
 0x37f   :  { %350 = vrot.lane.b32.xlu2 %v1027_v12, %s1233_s5 }
 0x380   :  { %v1029_v14 = vpop.eup %1028 }
 0x381   :  { %v331_v16 = vadd.f32 1.0, %v1029_v14 }
 0x383   :  { %1030 = vrcp.f32 %v331_v16  ;;  %v343_v19 = vand.u32 2147483648, %v331_v16  ;;  %vm337_vm10 = vweird.f32 %v331_v16  ;;  %v341_v22 = vand.u32 2147483647, %v331_v16 }
 0x385   :  { %v344_v24 = vor.u32 1.1754944e-38, %v343_v19  ;;  %vm342_vm12 = vcmp.eq.f32.partialorder %v341_v22, 8.507059e+37 }
 0x389   :  { %v1031_v15 = vpop.eup %1030 }
 0x38a   :  { %v333_v17 = vmul.f32 %v1031_v15, %v331_v16  ;;  %vm338_vm9 = vweird.f32 %v1031_v15 }
 0x38b   :  { %vm339_vm11 = vmor %vm337_vm10, %vm338_vm9 }
 0x38c   :  { %v334_v20 = vsub.f32 1.0, %v333_v17 }
 0x38e   :  { %v335_v18 = vmul.f32 %v1031_v15, %v334_v20 }
 0x390   :  { %v336_v21 = vadd.f32 %v1031_v15, %v335_v18 }
 0x392   :  { %v340_v23 = vsel %vm339_vm11, %v1031_v15, %v336_v21 }
 0x393   :  { %v345_v26 = vsel %vm342_vm12, %v344_v24, %v340_v23  ;;  %v796_v24 = vld [vmem:[%s1508_s7 + $0x18] sm:$0xff] }
 0x394   :  { %v348_v28 = vmul.f32 %v345_v26, %v290_v3  ;;  %842 = vmatpush.msra.mxu0 %v796_v24 }
 0x3d9   :  { %v351_v25 = vpop.permute.xlu2 %350 }
 0x3da   :  { %v353_v27 = vmul.f32 %v351_v25, %v345_v26  ;;  %v795_v25 = vld [vmem:[%s1508_s7 + $0x10] sm:$0xff] }
 0x3db   :  { %843 = vmatpush.msra.mxu0 %v795_v25 }
 0x3dc   :  { %355 = vrot.lane.b32.xlu0 %v353_v27, %s1230_s20  ;;  %v793_v27 = vld [vmem:[%s1508_s7] sm:$0xff] }
 0x44e   :  { %v356_v29 = vpop.permute.xlu0 %355 }
 0x44f   :  { %v358_v30 = vadd.f32 %v356_v29, %v348_v28 }
 0x451   :  { %1032 = vtanh.f32 %v358_v30 }
 0x457   :  { %v1033_v31 = vpop.eup %1032 }
 0x458   :  { %361 = vrot.lane.b32.xlu1 %v1033_v31, %s1233_s5  ;;  %v508_v31 = vld [vmem:[#allocation2 + $0x8] sm:$0x3] }
 0x4ca   :  { %v362_v32 = vpop.permute.xlu1 %361 }
 0x4cb   :  { %v364_v33 = vmul.f32 %v362_v32, %v345_v26  ;;  %v794_v26 = vld [vmem:[%s1508_s7 + $0x8] sm:$0xff] }
 0x4cc   :  { %844 = vmatpush.msra.mxu0 %v794_v26 }
 0x4cd   :  { %366 = vrot.lane.b32.xlu2 %v364_v33, %s1230_s20 }
 0x4ce   :  { %845 = vmatpush.msra.mxu0 %v793_v27 }
 0x527   :  { %v367_v34 = vpop.permute.xlu2 %366 }
 0x528   :  { %370 = vst.msk [vmem:[#allocation3 + $0x2] sm:$0x3] %vm301_vm8, %v367_v34  ;;  %987 = vmatmul.msk.f32.vlgmr.msrb.gmra.mxu2 %vm173_vm1, %v367_v34 }
 0x52f   :  { %v786_v35 = vld [vmem:[#allocation3 + $0x2] sm:$0x3] }
 0x530   :  { %811 = vst [vmem:[#allocation1 + $0x1] ss:$4 sm:$0xff] %v786_v35 }
 0x5ab   :  { %v392_v37 = vpop.f32.mrf.mxu2 }
 0x5ac   :  { %v395_v38 = vadd.f32 %v392_v37, %v372_v36 }
 0x5ae   :  { %1034 = vtanh.f32 %v395_v38  ;;  %v988_v40 = vmul.f32 -1.442695, %v395_v38 }
 0x5b0   :  { %1036 = vpow2.f32 %v988_v40 }
 0x5b4   :  { %v1035_v39 = vpop.eup %1034 }
 0x5b5   :  { %418 = vrot.lane.b32.xlu0 %v1035_v39, %s1233_s5 }
 0x5b6   :  { %v1037_v41 = vpop.eup %1036 }
 0x5b7   :  { %v399_v42 = vadd.f32 1.0, %v1037_v41 }
 0x5b9   :  { %1038 = vrcp.f32 %v399_v42  ;;  %v411_v48 = vand.u32 2147483648, %v399_v42  ;;  %vm405_vm14 = vweird.f32 %v399_v42  ;;  %v409_v49 = vand.u32 2147483647, %v399_v42 }
 0x5bb   :  { %v412_v51 = vor.u32 1.1754944e-38, %v411_v48  ;;  %vm410_vm0 = vcmp.eq.f32.partialorder %v409_v49, 8.507059e+37 }
 0x5bf   :  { %v1039_v43 = vpop.eup %1038 }
 0x5c0   :  { %v401_v44 = vmul.f32 %v1039_v43, %v399_v42  ;;  %vm406_vm13 = vweird.f32 %v1039_v43 }
 0x5c1   :  { %vm407_vm15 = vmor %vm405_vm14, %vm406_vm13 }
 0x5c2   :  { %v402_v45 = vsub.f32 1.0, %v401_v44 }
 0x5c4   :  { %v403_v46 = vmul.f32 %v1039_v43, %v402_v45 }
 0x5c6   :  { %v404_v47 = vadd.f32 %v1039_v43, %v403_v46 }
 0x5c8   :  { %v408_v50 = vsel %vm407_vm15, %v1039_v43, %v404_v47 }
 0x5c9   :  { %v413_v53 = vsel %vm410_vm0, %v412_v51, %v408_v50 }
 0x5ca   :  { %v416_v55 = vmul.f32 %v413_v53, %v358_v30 }
 0x627   :  { %v419_v52 = vpop.permute.xlu0 %418 }
 0x628   :  { %v421_v54 = vmul.f32 %v419_v52, %v413_v53 }
 0x62a   :  { %423 = vrot.lane.b32.xlu1 %v421_v54, %s1230_s20 }
 0x69c   :  { %v424_v56 = vpop.permute.xlu1 %423 }
 0x69d   :  { %v426_v57 = vadd.f32 %v424_v56, %v416_v55 }
 0x69f   :  { %1040 = vtanh.f32 %v426_v57 }
 0x6a5   :  { %v1041_v58 = vpop.eup %1040 }
 0x6a6   :  { %429 = vrot.lane.b32.xlu2 %v1041_v58, %s1233_s5  ;;  %v576_v58 = vld [vmem:[#allocation2 + $0xa] sm:$0x3] }
 0x700   :  { %v430_v59 = vpop.permute.xlu2 %429 }
 0x701   :  { %v432_v60 = vmul.f32 %v430_v59, %v413_v53 }
 0x703   :  { %434 = vrot.lane.b32.xlu0 %v432_v60, %s1230_s20 }
 0x775   :  { %v435_v61 = vpop.permute.xlu0 %434 }
 0x776   :  { %438 = vst.msk [vmem:[#allocation3 + $0x4] sm:$0x3] %vm301_vm8, %v435_v61  ;;  %989 = vmatmul.msk.f32.vlgmr.msrb.gmra.mxu3 %vm173_vm1, %v435_v61 }
 0x77d   :  { %v787_v62 = vld [vmem:[#allocation3 + $0x4] sm:$0x3] }
 0x77e   :  { %813 = vst [vmem:[#allocation1 + $0x2] ss:$4 sm:$0xff] %v787_v62 }
 0x7f9   :  { %v460_v0 = vpop.f32.mrf.mxu3 }
 0x7fa   :  { %v463_v1 = vadd.f32 %v460_v0, %v440_v63 }
 0x7fc   :  { %1042 = vtanh.f32 %v463_v1  ;;  %v990_v3 = vmul.f32 -1.442695, %v463_v1 }
 0x7fe   :  { %1044 = vpow2.f32 %v990_v3 }
 0x802   :  { %v1043_v2 = vpop.eup %1042 }
 0x803   :  { %486 = vrot.lane.b32.xlu1 %v1043_v2, %s1233_s5 }
 0x804   :  { %v1045_v4 = vpop.eup %1044 }
 0x805   :  { %v467_v5 = vadd.f32 1.0, %v1045_v4 }
 0x807   :  { %1046 = vrcp.f32 %v467_v5  ;;  %v479_v11 = vand.u32 2147483648, %v467_v5  ;;  %vm473_vm3 = vweird.f32 %v467_v5  ;;  %v477_v12 = vand.u32 2147483647, %v467_v5 }
 0x809   :  { %v480_v14 = vor.u32 1.1754944e-38, %v479_v11  ;;  %vm478_vm5 = vcmp.eq.f32.partialorder %v477_v12, 8.507059e+37 }
 0x80d   :  { %v1047_v6 = vpop.eup %1046 }
 0x80e   :  { %v469_v7 = vmul.f32 %v1047_v6, %v467_v5  ;;  %vm474_vm2 = vweird.f32 %v1047_v6 }
 0x80f   :  { %vm475_vm4 = vmor %vm473_vm3, %vm474_vm2 }
 0x810   :  { %v470_v8 = vsub.f32 1.0, %v469_v7 }
 0x812   :  { %v471_v9 = vmul.f32 %v1047_v6, %v470_v8 }
 0x814   :  { %v472_v10 = vadd.f32 %v1047_v6, %v471_v9 }
 0x816   :  { %v476_v13 = vsel %vm475_vm4, %v1047_v6, %v472_v10 }
 0x817   :  { %v481_v15 = vsel %vm478_vm5, %v480_v14, %v476_v13 }
 0x818   :  { %v484_v20 = vmul.f32 %v481_v15, %v426_v57 }
 0x875   :  { %v487_v16 = vpop.permute.xlu1 %486 }
 0x876   :  { %v489_v17 = vmul.f32 %v487_v16, %v481_v15 }
 0x878   :  { %491 = vrot.lane.b32.xlu2 %v489_v17, %s1230_s20 }
 0x8d2   :  { %v492_v18 = vpop.permute.xlu2 %491 }
 0x8d3   :  { %v494_v21 = vadd.f32 %v492_v18, %v484_v20 }
 0x8d5   :  { %1048 = vtanh.f32 %v494_v21 }
 0x8db   :  { %v1049_v19 = vpop.eup %1048 }
 0x8dc   :  { %497 = vrot.lane.b32.xlu0 %v1049_v19, %s1233_s5  ;;  %v644_v19 = vld [vmem:[#allocation2 + $0xc] sm:$0x3] }
 0x94e   :  { %v498_v22 = vpop.permute.xlu0 %497 }
 0x94f   :  { %v500_v23 = vmul.f32 %v498_v22, %v481_v15 }
 0x951   :  { %502 = vrot.lane.b32.xlu1 %v500_v23, %s1230_s20 }
 0x9c3   :  { %v503_v28 = vpop.permute.xlu1 %502 }
 0x9c4   :  { %506 = vst.msk [vmem:[#allocation3 + $0x6] sm:$0x3] %vm301_vm8, %v503_v28  ;;  %991 = vmatmul.msk.f32.vlgmr.msrb.gmra.mxu0 %vm173_vm1, %v503_v28 }
 0x9cb   :  { %v788_v29 = vld [vmem:[#allocation3 + $0x6] sm:$0x3] }
 0x9cc   :  { %815 = vst [vmem:[#allocation1 + $0x3] ss:$4 sm:$0xff] %v788_v29 }
 0x9d3   :  { %v824_v30 = vld.sshfl [vmem:[#allocation1] sm:$0xff pattern:$0x73625140] }
 0x9d4   :  { %999 = vmatmul.msk.f32.vlgmr.msra.gmra.mxu0 %vm173_vm1, %v824_v30 }
 0xa41   :  { %v528_v32 = vpop.f32.mrf.mxu0 }
 0xa42   :  { %v531_v33 = vadd.f32 %v528_v32, %v508_v31 }
 0xa44   :  { %1050 = vtanh.f32 %v531_v33  ;;  %v992_v35 = vmul.f32 -1.442695, %v531_v33 }
 0xa46   :  { %1052 = vpow2.f32 %v992_v35 }
 0xa4a   :  { %v1051_v34 = vpop.eup %1050 }
 0xa4b   :  { %554 = vrot.lane.b32.xlu2 %v1051_v34, %s1233_s5 }
 0xa4c   :  { %v1053_v36 = vpop.eup %1052 }
 0xa4d   :  { %v535_v37 = vadd.f32 1.0, %v1053_v36 }
 0xa4f   :  { %1054 = vrcp.f32 %v535_v37  ;;  %v547_v43 = vand.u32 2147483648, %v535_v37  ;;  %vm541_vm7 = vweird.f32 %v535_v37  ;;  %v545_v44 = vand.u32 2147483647, %v535_v37 }
 0xa51   :  { %v548_v46 = vor.u32 1.1754944e-38, %v547_v43  ;;  %vm546_vm10 = vcmp.eq.f32.partialorder %v545_v44, 8.507059e+37 }
 0xa55   :  { %v1055_v38 = vpop.eup %1054 }
 0xa56   :  { %v537_v39 = vmul.f32 %v1055_v38, %v535_v37  ;;  %vm542_vm6 = vweird.f32 %v1055_v38 }
 0xa57   :  { %vm543_vm9 = vmor %vm541_vm7, %vm542_vm6 }
 0xa58   :  { %v538_v40 = vsub.f32 1.0, %v537_v39 }
 0xa5a   :  { %v539_v41 = vmul.f32 %v1055_v38, %v538_v40 }
 0xa5c   :  { %v540_v42 = vadd.f32 %v1055_v38, %v539_v41 }
 0xa5e   :  { %v544_v45 = vsel %vm543_vm9, %v1055_v38, %v540_v42  ;;  %vm853_vm9 = vcmask 39936  }
 0xa5f   :  { %v549_v48 = vsel %vm546_vm10, %v548_v46, %v544_v45 }
 0xa60   :  { %v552_v50 = vmul.f32 %v549_v48, %v494_v21 }
 0xaa5   :  { %v555_v47 = vpop.permute.xlu2 %554 }
 0xaa6   :  { %v557_v49 = vmul.f32 %v555_v47, %v549_v48 }
 0xaa8   :  { %559 = vrot.lane.b32.xlu0 %v557_v49, %s1230_s20 }
 0xb1a   :  { %v560_v51 = vpop.permute.xlu0 %559 }
 0xb1b   :  { %v562_v52 = vadd.f32 %v560_v51, %v552_v50 }
 0xb1d   :  { %1056 = vtanh.f32 %v562_v52 }
 0xb23   :  { %v1057_v53 = vpop.eup %1056 }
 0xb24   :  { %565 = vrot.lane.b32.xlu1 %v1057_v53, %s1233_s5 }
 0xb96   :  { %v566_v54 = vpop.permute.xlu1 %565 }
 0xb97   :  { %v568_v55 = vmul.f32 %v566_v54, %v549_v48  ;;  %v712_v48 = vld [vmem:[#allocation2 + $0xe] sm:$0x3] }
 0xb99   :  { %570 = vrot.lane.b32.xlu2 %v568_v55, %s1230_s20 }
 0xbf3   :  { %v571_v56 = vpop.permute.xlu2 %570 }
 0xbf4   :  { %574 = vst.msk [vmem:[#allocation3 + $0x8] sm:$0x3] %vm301_vm8, %v571_v56  ;;  %993 = vmatmul.msk.f32.vlgmr.msra.gmra.mxu1 %vm173_vm1, %v571_v56 }
 0xbfb   :  { %v789_v57 = vld [vmem:[#allocation3 + $0x8] sm:$0x3] }
 0xbfc   :  { %817 = vst [vmem:[#allocation1 + $0x20] ss:$4 sm:$0xff] %v789_v57 }
 0xc71   :  { %v596_v59 = vpop.f32.mrf.mxu1 }
 0xc72   :  { %v599_v60 = vadd.f32 %v596_v59, %v576_v58 }
 0xc74   :  { %1058 = vtanh.f32 %v599_v60  ;;  %v994_v62 = vmul.f32 -1.442695, %v599_v60 }
 0xc76   :  { %1060 = vpow2.f32 %v994_v62 }
 0xc7a   :  { %v1059_v61 = vpop.eup %1058 }
 0xc7b   :  { %622 = vrot.lane.b32.xlu0 %v1059_v61, %s1233_s5 }
 0xc7c   :  { %v1061_v63 = vpop.eup %1060 }
 0xc7d   :  { %v603_v0 = vadd.f32 1.0, %v1061_v63 }
 0xc7f   :  { %1062 = vrcp.f32 %v603_v0  ;;  %v615_v6 = vand.u32 2147483648, %v603_v0  ;;  %vm609_vm12 = vweird.f32 %v603_v0  ;;  %v613_v7 = vand.u32 2147483647, %v603_v0 }
 0xc81   :  { %v616_v9 = vor.u32 1.1754944e-38, %v615_v6  ;;  %vm614_vm14 = vcmp.eq.f32.partialorder %v613_v7, 8.507059e+37 }
 0xc85   :  { %v1063_v1 = vpop.eup %1062 }
 0xc86   :  { %v605_v2 = vmul.f32 %v1063_v1, %v603_v0  ;;  %vm610_vm11 = vweird.f32 %v1063_v1 }
 0xc87   :  { %vm611_vm13 = vmor %vm609_vm12, %vm610_vm11 }
 0xc88   :  { %v606_v3 = vsub.f32 1.0, %v605_v2 }
 0xc8a   :  { %v607_v4 = vmul.f32 %v1063_v1, %v606_v3  ;;  %v1449_v3 = vld [vmem:[%s1509_s8] ss:$0 sm:$0xff] }
 0xc8c   :  { %v608_v5 = vadd.f32 %v1063_v1, %v607_v4  ;;  %v847_v4 = vpop.f32.mrf.mxu0 }
 0xc8e   :  { %v612_v8 = vsel %vm611_vm13, %v1063_v1, %v608_v5  ;;  %v848_v5 = vadd.f32 %v1449_v3, %v847_v4 }
 0xc8f   :  { %v617_v11 = vsel %vm614_vm14, %v616_v9, %v612_v8 }
 0xc90   :  { %v620_v13 = vmul.f32 %v617_v11, %v562_v52  ;;  %v854_v6 = vsel %vm853_vm9, %v848_v5, -inf }
 0xced   :  { %v623_v10 = vpop.permute.xlu0 %622 }
 0xcee   :  { %v625_v12 = vmul.f32 %v623_v10, %v617_v11 }
 0xcf0   :  { %627 = vrot.lane.b32.xlu1 %v625_v12, %s1230_s20 }
 0xd62   :  { %v628_v14 = vpop.permute.xlu1 %627 }
 0xd63   :  { %v630_v16 = vadd.f32 %v628_v14, %v620_v13 }
 0xd65   :  { %1064 = vtanh.f32 %v630_v16 }
 0xd6b   :  { %v1065_v15 = vpop.eup %1064 }
 0xd6c   :  { %633 = vrot.lane.b32.xlu2 %v1065_v15, %s1233_s5 }
 0xdc6   :  { %v634_v17 = vpop.permute.xlu2 %633 }
 0xdc7   :  { %v636_v20 = vmul.f32 %v634_v17, %v617_v11 }
 0xdc9   :  { %638 = vrot.lane.b32.xlu0 %v636_v20, %s1230_s20 }
 0xe3b   :  { %v639_v18 = vpop.permute.xlu0 %638 }
 0xe3c   :  { %642 = vst.msk [vmem:[#allocation3 + $0xa] sm:$0x3] %vm301_vm8, %v639_v18  ;;  %995 = vmatmul.msk.f32.vlgmr.msra.gmra.mxu2 %vm173_vm1, %v639_v18 }
 0xe43   :  { %v790_v21 = vld [vmem:[#allocation3 + $0xa] sm:$0x3] }
 0xe44   :  { %819 = vst [vmem:[#allocation1 + $0x21] ss:$4 sm:$0xff] %v790_v21 }
 0xebf   :  { %v664_v22 = vpop.f32.mrf.mxu2 }
 0xec0   :  { %v667_v23 = vadd.f32 %v664_v22, %v644_v19 }
 0xec2   :  { %1066 = vtanh.f32 %v667_v23  ;;  %v996_v25 = vmul.f32 -1.442695, %v667_v23 }
 0xec4   :  { %1068 = vpow2.f32 %v996_v25 }
 0xec8   :  { %v1067_v24 = vpop.eup %1066 }
 0xec9   :  { %690 = vrot.lane.b32.xlu1 %v1067_v24, %s1233_s5 }
 0xeca   :  { %v1069_v26 = vpop.eup %1068 }
 0xecb   :  { %v671_v27 = vadd.f32 1.0, %v1069_v26 }
 0xecd   :  { %1070 = vrcp.f32 %v671_v27  ;;  %v683_v33 = vand.u32 2147483648, %v671_v27  ;;  %vm677_vm0 = vweird.f32 %v671_v27  ;;  %v681_v34 = vand.u32 2147483647, %v671_v27 }
 0xecf   :  { %v684_v36 = vor.u32 1.1754944e-38, %v683_v33  ;;  %vm682_vm3 = vcmp.eq.f32.partialorder %v681_v34, 8.507059e+37 }
 0xed3   :  { %v1071_v28 = vpop.eup %1070 }
 0xed4   :  { %v673_v29 = vmul.f32 %v1071_v28, %v671_v27  ;;  %vm678_vm15 = vweird.f32 %v1071_v28 }
 0xed5   :  { %vm679_vm2 = vmor %vm677_vm0, %vm678_vm15 }
 0xed6   :  { %v674_v30 = vsub.f32 1.0, %v673_v29 }
 0xed8   :  { %v675_v31 = vmul.f32 %v1071_v28, %v674_v30 }
 0xeda   :  { %v676_v32 = vadd.f32 %v1071_v28, %v675_v31 }
 0xedc   :  { %v680_v35 = vsel %vm679_vm2, %v1071_v28, %v676_v32 }
 0xedd   :  { %v685_v38 = vsel %vm682_vm3, %v684_v36, %v680_v35 }
 0xede   :  { %v688_v40 = vmul.f32 %v685_v38, %v630_v16 }
 0xf3b   :  { %v691_v37 = vpop.permute.xlu1 %690 }
 0xf3c   :  { %v693_v39 = vmul.f32 %v691_v37, %v685_v38 }
 0xf3e   :  { %695 = vrot.lane.b32.xlu2 %v693_v39, %s1230_s20 }
 0xf98   :  { %v696_v41 = vpop.permute.xlu2 %695 }
 0xf99   :  { %v698_v42 = vadd.f32 %v696_v41, %v688_v40 }
 0xf9b   :  { %1072 = vtanh.f32 %v698_v42 }
 0xfa1   :  { %v1073_v43 = vpop.eup %1072 }
 0xfa2   :  { %701 = vrot.lane.b32.xlu0 %v1073_v43, %s1233_s5 }
0x1014   :  { %v702_v44 = vpop.permute.xlu0 %701 }
0x1015   :  { %v704_v45 = vmul.f32 %v702_v44, %v685_v38 }
0x1017   :  { %706 = vrot.lane.b32.xlu1 %v704_v45, %s1230_s20 }
0x1089   :  { %v707_v46 = vpop.permute.xlu1 %706 }
0x108a   :  { %710 = vst.msk [vmem:[#allocation3 + $0xc] sm:$0x3] %vm301_vm8, %v707_v46  ;;  %997 = vmatmul.msk.f32.vlgmr.msra.gmra.mxu3 %vm173_vm1, %v707_v46 }
0x1091   :  { %v791_v47 = vld [vmem:[#allocation3 + $0xc] sm:$0x3] }
0x1092   :  { %821 = vst [vmem:[#allocation1 + $0x22] ss:$4 sm:$0xff] %v791_v47 }
0x110d   :  { %v732_v49 = vpop.f32.mrf.mxu3 }
0x110e   :  { %v735_v50 = vadd.f32 %v732_v49, %v712_v48 }
0x1110   :  { %1074 = vtanh.f32 %v735_v50  ;;  %v998_v52 = vmul.f32 -1.442695, %v735_v50 }
0x1112   :  { %1076 = vpow2.f32 %v998_v52 }
0x1116   :  { %v1075_v51 = vpop.eup %1074 }
0x1117   :  { %758 = vrot.lane.b32.xlu2 %v1075_v51, %s1233_s5 }
0x1118   :  { %v1077_v53 = vpop.eup %1076 }
0x1119   :  { %v739_v54 = vadd.f32 1.0, %v1077_v53 }
0x111b   :  { %1078 = vrcp.f32 %v739_v54  ;;  %v751_v60 = vand.u32 2147483648, %v739_v54  ;;  %vm745_vm5 = vweird.f32 %v739_v54  ;;  %v749_v61 = vand.u32 2147483647, %v739_v54 }
0x111d   :  { %v752_v63 = vor.u32 1.1754944e-38, %v751_v60  ;;  %vm750_vm7 = vcmp.eq.f32.partialorder %v749_v61, 8.507059e+37 }
0x1121   :  { %v1079_v55 = vpop.eup %1078 }
0x1122   :  { %v741_v56 = vmul.f32 %v1079_v55, %v739_v54  ;;  %vm746_vm4 = vweird.f32 %v1079_v55 }
0x1123   :  { %vm747_vm6 = vmor %vm745_vm5, %vm746_vm4 }
0x1124   :  { %v742_v57 = vsub.f32 1.0, %v741_v56 }
0x1126   :  { %v743_v58 = vmul.f32 %v1079_v55, %v742_v57 }
0x1128   :  { %v744_v59 = vadd.f32 %v1079_v55, %v743_v58 }
0x112a   :  { %v748_v62 = vsel %vm747_vm6, %v1079_v55, %v744_v59 }
0x112b   :  { %v753_v1 = vsel %vm750_vm7, %v752_v63, %v748_v62 }
0x112c   :  { %v756_v7 = vmul.f32 %v753_v1, %v698_v42 }
0x1171   :  { %v759_v0 = vpop.permute.xlu2 %758 }
0x1172   :  { %v761_v2 = vmul.f32 %v759_v0, %v753_v1 }
0x1174   :  { %763 = vrot.lane.b32.xlu0 %v761_v2, %s1230_s20 }
0x119e   :  { %855 = vmax.xlane.f32.xlu0 %v854_v6 }
0x11e6   :  { %v764_v8 = vpop.permute.xlu0 %763 }
0x11e7   :  { %v766_v9 = vadd.f32 %v764_v8, %v756_v7 }
0x11e9   :  { %1080 = vtanh.f32 %v766_v9  ;;  %781 = vrot.lane.b32.xlu0 %v766_v9, %s1234_s27 }
0x11ef   :  { %v1081_v10 = vpop.eup %1080 }
0x11f0   :  { %769 = vrot.lane.b32.xlu1 %v1081_v10, %s1233_s5  ;;  %s959_s5 = sshll.u32 %s1236_s2, 4  ;;  %s960_s5 = int_to_ptr.vmem [resolvable:$true] %s959_s5 }
0x1211   :  { %v856_v11 = vpop.xlane.xlu0 %855 }
0x1212   :  { %v860_v16 = vsub.f32 %v848_v5, %v856_v11 }
0x1214   :  { %v862_v15 = vmul.f32 1.442695, %v860_v16 }
0x1216   :  { %1082 = vpow2.f32 %v862_v15 }
0x121c   :  { %v1083_v17 = vpop.eup %1082 }
0x121d   :  { %v866_v20 = vsel %vm853_vm9, %v1083_v17, 0.0 }
0x125b   :  { %v782_v12 = vpop.permute.xlu0 %781 }
0x125c   :  { %784 = vst.msk [vmem:[#allocation11] sm:$0x3] %vm301_vm8, %v782_v12 }
0x125d   :  { %964 = dma.vmem_to_hbm [thread:$0]  %s960_s5, 32, %s962_s10, [#allocation12]  }
0x1262   :  { %v770_v13 = vpop.permute.xlu1 %769 }
0x1263   :  { %v772_v14 = vmul.f32 %v770_v13, %v753_v1 }
0x1265   :  { %774 = vrot.lane.b32.xlu2 %v772_v14, %s1230_s20 }
0x128e   :  { %867 = vadd.xlane.f32.xlu2 %v866_v20 }
0x12bf   :  { %v775_v18 = vpop.permute.xlu2 %774 }
0x12c0   :  { %778 = vst.msk [vmem:[#allocation3 + $0xe] sm:$0x3] %vm301_vm8, %v775_v18 }
0x12c1   :  { %779 = vst.msk [vmem:[#allocation10] sm:$0x3] %vm301_vm8, %v775_v18  ;;  %vm932_vm8 = vcmask 33792  }
0x12c2   :  { %953 = dma.vmem_to_hbm [thread:$0]  %s949_s16, 32, %s951_s19, [#allocation6]  }
0x12c7   :  { %v792_v21 = vld [vmem:[#allocation3 + $0xe] sm:$0x3] }
0x12c8   :  { %823 = vst [vmem:[#allocation1 + $0x23] ss:$4 sm:$0xff] %v792_v21 }
0x12cf   :  { %v825_v19 = vld.sshfl [vmem:[#allocation1 + $0x20] sm:$0xff pattern:$0x73625140] }
0x12d0   :  { %1000 = vmatmul.msk.f32.gmra.mxu0 %vm173_vm1, %v825_v19 }
0x1301   :  { %v868_v22 = vpop.xlane.xlu2 %867 }
0x1302   :  { %1084 = vlog2.f32 %v868_v22 }
0x1308   :  { %v1085_v23 = vpop.eup %1084 }
0x1309   :  { %v873_v24 = vmul.f32 0.6931472, %v1085_v23 }
0x130b   :  { %v876_v25 = vsub.f32 %v860_v16, %v873_v24 }
0x130d   :  { %v878_v26 = vadd.f32 -0.105360515, %v876_v25 }
0x130f   :  { %v1001_v27 = vadd.f32 3.912023, %v878_v26  ;;  %v880_v39 = vmax.f32 %v878_v26, -3.912023  ;;  %v886_v41 = vadd.f32 -3.912023, %v878_v26 }
0x1311   :  { %v888_v28 = vand.u32 2147483647, %v1001_v27  ;;  %vm884_vm10 = vcmp.ne.f32.partialorder %v1001_v27, %v1001_v27 }
0x1313   :  { %v890_v29 = vsub.f32 0.0, %v888_v28 }
0x1315   :  { %v892_v30 = vmul.f32 1.442695, %v890_v29 }
0x1317   :  { %1086 = vpow2.f32 %v892_v30 }
0x131d   :  { %v1087_v31 = vpop.eup %1086 }
0x131e   :  { %v896_v32 = vadd.f32 1.0, %v1087_v31  ;;  %v899_v33 = vmul.f32 -0.5, %v1087_v31  ;;  %v902_v35 = vand.u32 2147483647, %v1087_v31 }
0x1320   :  { %1088 = vlog2.f32 %v896_v32  ;;  %v900_v34 = vadd.f32 1.0, %v899_v33  ;;  %vm903_vm1 = vcmp.lt.f32.partialorder %v902_v35, 0.0004427343 }
0x1322   :  { %v901_v38 = vmul.f32 %v1087_v31, %v900_v34 }
0x1326   :  { %v1089_v36 = vpop.eup %1088 }
0x1327   :  { %v898_v37 = vmul.f32 0.6931472, %v1089_v36 }
0x1329   :  { %v904_v40 = vsel %vm903_vm1, %v901_v38, %v898_v37 }
0x132a   :  { %v914_v42 = vadd.f32 %v904_v40, %v880_v39 }
0x132c   :  { %v916_v43 = vsel %vm884_vm10, %v886_v41, %v914_v42 }
0x132d   :  { %v920_v44 = vrot.slane %v916_v43, 2  ;;  %v921_v45 = vrot.slane %v916_v43, 4  ;;  %v922_v46 = vrot.slane %v916_v43, 6  ;;  %933 = vst.msk [vmem:[%s1512_s11] sm:$0x3] %vm932_vm8, %v916_v43 }
0x132f   :  { %934 = vst.msk [vmem:[%s1512_s11 + $0x2] sm:$0x3] %vm932_vm8, %v920_v44 }
0x1330   :  { %935 = vst.msk [vmem:[%s1512_s11 + $0x4] sm:$0x3] %vm932_vm8, %v921_v45 }
0x1331   :  { %936 = vst.msk [vmem:[%s1512_s11 + $0x6] sm:$0x3] %vm932_vm8, %v922_v46 }
0x134d   :  { %v850_v47 = vpop.f32.mrf.mxu0 }
0x134e   :  { %v851_v48 = vadd.f32 %v1449_v3, %v850_v47 }
0x1350   :  { %v857_v49 = vsel %vm853_vm9, %v851_v48, -inf }
0x1351   :  { %858 = vmax.xlane.f32.xlu1 %v857_v49 }
0x13c4   :  { %v859_v50 = vpop.xlane.xlu1 %858 }
0x13c5   :  { %v861_v51 = vsub.f32 %v851_v48, %v859_v50 }
0x13c7   :  { %v864_v52 = vmul.f32 1.442695, %v861_v51 }
0x13c9   :  { %1090 = vpow2.f32 %v864_v52 }
0x13cf   :  { %v1091_v53 = vpop.eup %1090 }
0x13d0   :  { %v869_v54 = vsel %vm853_vm9, %v1091_v53, 0.0 }
0x13d1   :  { %870 = vadd.xlane.f32.xlu2 %v869_v54 }
0x1444   :  { %v871_v55 = vpop.xlane.xlu2 %870 }
0x1445   :  { %1092 = vlog2.f32 %v871_v55 }
0x144b   :  { %v1093_v56 = vpop.eup %1092 }
0x144c   :  { %v875_v57 = vmul.f32 0.6931472, %v1093_v56 }
0x144e   :  { %v877_v58 = vsub.f32 %v861_v51, %v875_v57 }
0x1450   :  { %v879_v59 = vadd.f32 -0.105360515, %v877_v58 }
0x1452   :  { %v1002_v60 = vadd.f32 3.912023, %v879_v59  ;;  %v881_v8 = vmax.f32 %v879_v59, -3.912023  ;;  %v887_v10 = vadd.f32 -3.912023, %v879_v59 }
0x1454   :  { %v889_v61 = vand.u32 2147483647, %v1002_v60  ;;  %vm885_vm12 = vcmp.ne.f32.partialorder %v1002_v60, %v1002_v60 }
0x1456   :  { %v891_v62 = vsub.f32 0.0, %v889_v61 }
0x1458   :  { %v894_v63 = vmul.f32 1.442695, %v891_v62 }
0x145a   :  { %1094 = vpow2.f32 %v894_v63 }
0x1460   :  { %v1095_v0 = vpop.eup %1094 }
0x1461   :  { %v905_v1 = vadd.f32 1.0, %v1095_v0  ;;  %v908_v2 = vmul.f32 -0.5, %v1095_v0  ;;  %v911_v4 = vand.u32 2147483647, %v1095_v0 }
0x1463   :  { %1096 = vlog2.f32 %v905_v1  ;;  %v909_v3 = vadd.f32 1.0, %v908_v2  ;;  %vm912_vm11 = vcmp.lt.f32.partialorder %v911_v4, 0.0004427343 }
0x1465   :  { %v910_v7 = vmul.f32 %v1095_v0, %v909_v3 }
0x1469   :  { %v1097_v5 = vpop.eup %1096 }
0x146a   :  { %v907_v6 = vmul.f32 0.6931472, %v1097_v5 }
0x146c   :  { %v913_v9 = vsel %vm912_vm11, %v910_v7, %v907_v6 }
0x146d   :  { %v915_v11 = vadd.f32 %v913_v9, %v881_v8 }
0x146f   :  { %v917_v12 = vsel %vm885_vm12, %v887_v10, %v915_v11 }
0x1470   :  { %v923_v13 = vrot.slane %v917_v12, 2  ;;  %v924_v14 = vrot.slane %v917_v12, 4  ;;  %v925_v16 = vrot.slane %v917_v12, 6  ;;  %937 = vst.msk [vmem:[%s1512_s11 + $0x8] sm:$0x3] %vm932_vm8, %v917_v12 }
0x1472   :  { %938 = vst.msk [vmem:[%s1512_s11 + $0xa] sm:$0x3] %vm932_vm8, %v923_v13 }
0x1473   :  { %939 = vst.msk [vmem:[%s1512_s11 + $0xc] sm:$0x3] %vm932_vm8, %v924_v14 }
0x1474   :  { %940 = vst.msk [vmem:[%s1512_s11 + $0xe] sm:$0x3] %vm932_vm8, %v925_v16 }
0x1475   :  { %1222 = dma.done.wait [#allocation6], 32  }
0x1476   :  { %1223 = vsyncadd [#allocation6], 4294967264 }
0x1477   :  { %1224 = dma.done.wait [#allocation12], 32  }
0x1478   :  { %1225 = vsyncadd [#allocation12], 4294967264 }
0x1479   :  { %975 = vsyncpa [#allocation5], 1 }
0x147a   :  { %976 = vsyncpa [#allocation8], 1 }
0x147b   :  { %977 = vsyncpa [#allocation6], 1 }
0x147c   :  { %978 = vsyncpa [#allocation12], 1 }

</bundles_post_ra>
